<compile_context>
chip_gen: v7x
topology: tpu7x:2x2x1
jax: 0.10.0
libtpu: 0.0.40
codegen_flags: <defaults>
</compile_context>

<pallas_src>
import functools

import jax
import jax.numpy as jnp
from jax import lax
from jax.experimental import pallas as pl
from jax.experimental.pallas import tpu as pltpu

NEG = -1e9            # acts as -inf for padded classes (f32-safe)
LANE = 128            # TPU lane width; emission class axis padded to this
VMEM_LIMIT = 32 * 1024 * 1024


def _round_up(x, m):
    return ((x + m - 1) // m) * m


# -----------------------------------------------------------------------------
# Kernel 1: fused Linear (x @ W + b) + softmax over the lane-padded class axis
# -----------------------------------------------------------------------------
def _fc_softmax_kernel(x_ref, w_ref, b_ref, emis_ref, probs_ref):
    # f32 activations arrive via DMA; cast to bf16 on the VPU right before the
    # MXU (no extra HBM pass for a standalone cast).  Accumulate in f32.
    x = x_ref[...].astype(jnp.bfloat16)
    logits = jnp.dot(x, w_ref[...], preferred_element_type=jnp.float32)
    logits = logits + b_ref[...]
    emis_ref[...] = logits
    m = jnp.max(logits, axis=-1, keepdims=True)
    e = jnp.exp(logits - m)
    s = jnp.sum(e, axis=-1, keepdims=True)
    # approx reciprocal uses the otherwise idle EUP slot instead of a divide
    probs_ref[...] = e * pl.reciprocal(s, approx=True)


def fc_softmax(x, w_p, b_p, *, tile_rows=512):
    """x: (N, E) f32; w_p: (E, Cp) bf16 padded weight; b_p: (1, Cp) f32 bias.

    Returns (emissions, probs), each (N, Cp) f32 (pad classes = -1e9 / ~0).
    """
    N, E = x.shape
    Cp = w_p.shape[1]
    tile_rows = min(tile_rows, _round_up(N, 8))       # avoid huge pad on tiny N
    n_pad = (-N) % tile_rows
    if n_pad:
        x = jnp.pad(x, ((0, n_pad), (0, 0)))
    Np = N + n_pad
    emis, probs = pl.pallas_call(
        _fc_softmax_kernel,
        out_shape=(jax.ShapeDtypeStruct((Np, Cp), jnp.float32),
                   jax.ShapeDtypeStruct((Np, Cp), jnp.float32)),
        grid=(Np // tile_rows,),
        in_specs=[pl.BlockSpec((tile_rows, E), lambda i: (i, 0)),
                  pl.BlockSpec((E, Cp), lambda i: (0, 0)),
                  pl.BlockSpec((1, Cp), lambda i: (0, 0))],
        out_specs=(pl.BlockSpec((tile_rows, Cp), lambda i: (i, 0)),
                   pl.BlockSpec((tile_rows, Cp), lambda i: (i, 0))),
        compiler_params=pltpu.CompilerParams(
            dimension_semantics=("parallel",),
            vmem_limit_bytes=VMEM_LIMIT),
    )(x, w_p, b_p)
    if n_pad:
        emis, probs = emis[:N], probs[:N]
    return emis, probs


# -----------------------------------------------------------------------------
# Kernel 2: linear-chain CRF (gold score, log-partition, Viterbi decode)
#   * single fused time recurrence (forward algorithm + Viterbi + gold score)
#   * recurrence runs on the REAL C classes only (emissions lane-sliced once
#     per step); everything elementwise stays f32 (v5e-safe)
# -----------------------------------------------------------------------------
def _crf_kernel(emis_ref, tags_ref, mask_ref, trans_t_ref, trans_flat_ref,
                start_ref, end_ref,
                llh_ref, dtags_ref, hist_ref):
    S, TB, Cp = emis_ref.shape
    Bp = tags_ref.shape[1]
    C = trans_t_ref.shape[0]             # real number of classes
    CC = trans_flat_ref.shape[1]         # C * C

    trans_t = trans_t_ref[...]           # (C, C)  [next, prev] = trans[prev, next]
    trans_flat = trans_flat_ref[...]     # (1, CC) row-major trans[prev, next]
    start = start_ref[...]               # (1, C)
    end = end_ref[...]                   # (1, C)

    # ---- hoisted loop-invariant iotas / batch-column selector ----------------
    gb = pl.program_id(0)
    lane_b = lax.broadcasted_iota(jnp.int32, (TB, Bp), 1)
    sub_b = lax.broadcasted_iota(jnp.int32, (TB, Bp), 0)
    sel = lane_b == (gb * TB + sub_b)                    # picks this tile's cols
    lane_c = lax.broadcasted_iota(jnp.int32, (TB, C), 1)
    lane_cc = lax.broadcasted_iota(jnp.int32, (TB, CC), 1)
    lane3 = lax.broadcasted_iota(jnp.int32, (TB, C, C), 2)
    ident = lax.broadcasted_iota(jnp.int32, (TB, C), 1)

    def pick(row, zero):                 # (1, Bp) row -> (TB, 1) column
        return jnp.sum(jnp.where(sel, row, zero), axis=1, keepdims=True)

    # ---- t = 0 init (torchcrf assumes mask[0] == 1) ---------------------------
    tag0 = pick(tags_ref[pl.ds(0, 1), :], 0)             # (TB, 1) int32
    e0 = emis_ref[0][:, :C]                              # (TB, C)
    oh0 = lane_c == tag0
    gold = (jnp.sum(jnp.where(oh0, start, 0.0), axis=1, keepdims=True)
            + jnp.sum(jnp.where(oh0, e0, 0.0), axis=1, keepdims=True))
    alpha = start + e0                                   # (TB, C)
    vscore = alpha

    # ---- fused gold + forward-algorithm + Viterbi recurrence -----------------
    def step(t, carry):
        alpha, vscore, gold, prev_tag, last_tag = carry
        e_t = emis_ref[t][:, :C]                         # (TB, C)
        tag_t = pick(tags_ref[pl.ds(t, 1), :], 0)        # (TB, 1) int32
        m_t = pick(mask_ref[pl.ds(t, 1), :], 0.0)        # (TB, 1) f32
        keep = m_t > 0.5

        # gold (numerator) score: emission + transition gathers via one-hots
        oh = lane_c == tag_t
        e_sel = jnp.sum(jnp.where(oh, e_t, 0.0), axis=1, keepdims=True)
        flat = prev_tag * C + tag_t
        oh_f = lane_cc == flat
        t_sel = jnp.sum(jnp.where(oh_f, trans_flat, 0.0), axis=1, keepdims=True)
        gold = gold + m_t * (e_sel + t_sel)
        # TODO(synk): an all-zero mask row keeps last_tag = tags[0] (torchcrf
        # requires mask[0]=1, so this only matters for malformed inputs).
        last_tag = jnp.where(keep, tag_t, last_tag)
        prev_tag = tag_t

        # forward algorithm: logsumexp over the previous state (lane axis, C)
        fmat = alpha[:, None, :] + trans_t[None, :, :]   # (TB, C_next, C_prev)
        fmax = jnp.max(fmat, axis=-1)
        lse = fmax + jnp.log(jnp.sum(jnp.exp(fmat - fmax[..., None]), axis=-1))
        alpha = jnp.where(keep, lse + e_t, alpha)

        # Viterbi: max / argmax over the previous state (lowest index on ties)
        vmat = vscore[:, None, :] + trans_t[None, :, :]
        vbest = jnp.max(vmat, axis=-1)
        vidx = jnp.min(jnp.where(vmat >= vbest[..., None], lane3, C), axis=-1)
        hist_ref[t] = jnp.where(keep, vidx, ident)
        vscore = jnp.where(keep, vbest + e_t, vscore)
        return alpha, vscore, gold, prev_tag, last_tag

    alpha, vscore, gold, _ptag, last_tag = lax.fori_loop(
        1, S, step, (alpha, vscore, gold, tag0, tag0))

    # ---- end transition / log-partition / per-row log-likelihood -------------
    oh_last = lane_c == last_tag
    gold = gold + jnp.sum(jnp.where(oh_last, end, 0.0), axis=1, keepdims=True)

    a = alpha + end
    amax = jnp.max(a, axis=-1, keepdims=True)
    logz = amax + jnp.log(jnp.sum(jnp.exp(a - amax), axis=-1, keepdims=True))
    llh_ref[...] = gold - logz

    # ---- Viterbi termination + backtrace --------------------------------------
    v = vscore + end
    vbest = jnp.max(v, axis=-1, keepdims=True)
    best_tag = jnp.min(jnp.where(v >= vbest, lane_c, C), axis=-1)   # (TB,)
    dtags_ref[S - 1] = best_tag[:, None]

    def back(i, cur):
        t = S - 2 - i
        hist_t1 = hist_ref[t + 1]                        # (TB, C)
        ohc = lane_c == cur[:, None]
        prev = jnp.sum(jnp.where(ohc, hist_t1, 0), axis=1)
        dtags_ref[t] = prev[:, None]
        return prev

    lax.fori_loop(0, S - 1, back, best_tag)


def crf_forward_decode(emis, tags_sb, mask_sb, trans_t_cc, trans_flat,
                       start_c, end_c):
    """emis: (S, B, Cp) f32; tags/mask: (S, B); trans_t_cc: (C, C) = trans.T."""
    S, B, Cp = emis.shape
    C = trans_t_cc.shape[0]
    TB = 8
    Bp = _round_up(B, TB)
    if Bp != B:                          # pad batch so the grid splits evenly
        emis = jnp.pad(emis, ((0, 0), (0, Bp - B), (0, 0)))
        tags_sb = jnp.pad(tags_sb, ((0, 0), (0, Bp - B)))
        mask_sb = jnp.pad(mask_sb, ((0, 0), (0, Bp - B)))
    tags_sb = tags_sb.astype(jnp.int32)
    mask_sb = mask_sb.astype(jnp.float32)

    llh, dtags = pl.pallas_call(
        _crf_kernel,
        out_shape=(
            jax.ShapeDtypeStruct((Bp, 1), jnp.float32),    # gold - logZ per row
            jax.ShapeDtypeStruct((S, Bp, 1), jnp.int32),   # decoded tags
        ),
        grid=(Bp // TB,),
        in_specs=[
            pl.BlockSpec((S, TB, Cp), lambda b: (0, b, 0)),   # emissions
            pl.BlockSpec((S, Bp), lambda b: (0, 0)),          # tags  (dense 2-D)
            pl.BlockSpec((S, Bp), lambda b: (0, 0)),          # mask  (dense 2-D)
            pl.BlockSpec((C, C), lambda b: (0, 0)),           # trans^T
            pl.BlockSpec((1, C * C), lambda b: (0, 0)),       # trans (flat)
            pl.BlockSpec((1, C), lambda b: (0, 0)),           # start
            pl.BlockSpec((1, C), lambda b: (0, 0)),           # end
        ],
        out_specs=(
            pl.BlockSpec((TB, 1), lambda b: (b, 0)),
            # TODO(synk): (S, TB, 1) trailing-singleton layout retained for the
            # decoded tags; a dense batch-minor (S, TB) output block violates
            # the 128-lane tiling rule, and the data is tiny (int32/token).
            pl.BlockSpec((S, TB, 1), lambda b: (0, b, 0)),
        ),
        # TODO(synk): (S, TB, C) backpointer scratch kept 3-D for lowering
        # robustness instead of the (S, TB*C) lane-flattened variant.
        scratch_shapes=[pltpu.VMEM((S, TB, C), jnp.int32)],
        compiler_params=pltpu.CompilerParams(
            dimension_semantics=("parallel",),
            vmem_limit_bytes=VMEM_LIMIT),
    )(emis, tags_sb, mask_sb, trans_t_cc, trans_flat, start_c, end_c)
    return llh[:B, 0], dtags[:, :B, 0]


# -----------------------------------------------------------------------------
# Plain-JAX glue
# -----------------------------------------------------------------------------
def fc_nll_loss_mean(y_pred, y, y_mask, gamma=None):
    # TODO(synk): exact external fc_nll_loss_mean not available; standard
    # focal-weighted NLL with masked token-mean is used.
    if gamma is None:
        gamma = 2.0
    y_pred = y_pred.astype(jnp.float32)                           # (S, B, Cp)
    p = jnp.take_along_axis(y_pred, y[..., None], axis=-1)[..., 0]
    g = (1.0 - jnp.clip(p, 0.01, 0.99)) ** gamma
    cost = -g * jnp.log(p + 1e-8)
    m = y_mask.astype(jnp.float32)
    loss = jnp.sum(cost * m) / jnp.maximum(jnp.sum(m), 1.0)
    return loss, g


def bert_stub(params, input_ids, token_type_ids, attention_mask):
    # TODO(synk): pretrained BertModel cannot be loaded in-script; deterministic
    # embedding + LayerNorm stand-in producing last_hidden_state (B, S, E).
    B, S = input_ids.shape
    h = (params["word_emb"][input_ids]
         + params["pos_emb"][None, :S, :]
         + params["type_emb"][token_type_ids])
    mu = jnp.mean(h, axis=-1, keepdims=True)
    var = jnp.var(h, axis=-1, keepdims=True)
    h = (h - mu) / jnp.sqrt(var + 1e-12) * params["ln_g"] + params["ln_b"]
    return h


@functools.partial(jax.jit, static_argnames=("seq_len", "gamma"))
def _generator_compute(params, input_ids, attention_mask, token_type_ids,
                       in_mask_matrix, in_tag_matrix, *, seq_len, gamma):
    B = input_ids.shape[0]
    S = seq_len
    C = params["fc_b"].shape[0]
    E = params["fc_w"].shape[1]
    Cp = max(LANE, _round_up(C, LANE))            # lane-dense class axis

    # mask_matrix / tag_matrix transposed to (S, B) as in the torch code
    mask_matrix = in_mask_matrix.astype(jnp.float32).T
    tag_matrix = in_tag_matrix.astype(jnp.int32).T

    sequence_representation = bert_stub(params, input_ids, token_type_ids,
                                        attention_mask)          # (B, S, E)
    # TODO(synk): F.dropout omitted (deterministic, eval-mode forward)
    x = sequence_representation.reshape(B * S, E)

    # --- Pallas kernel 1: fc projection + softmax (padded class columns) ---
    w_p = jnp.pad(params["fc_w"].T, ((0, 0), (0, Cp - C))).astype(jnp.bfloat16)
    b_p = jnp.pad(params["fc_b"], (0, Cp - C),
                  constant_values=NEG).reshape(1, Cp).astype(jnp.float32)
    emis_flat, probs_flat = fc_softmax(x, w_p, b_p)

    # NOTE: original torch code uses .view(seq_len, batch, C) on a batch-major
    # flat tensor (a reshape, NOT a transpose); reproduce that exactly.  The
    # padded class columns are kept (exactly -1e9 / ~0) so no slice+re-pad
    # HBM roundtrip happens between the two kernels.
    sequence_emissions = emis_flat.reshape(S, B, Cp)
    probs = probs_flat.reshape(S, B, Cp)
    probs_int = probs.astype(jnp.int32)     # torch.tensor(probs, dtype=int64)

    loss_ft_fc, _g = fc_nll_loss_mean(probs_int, tag_matrix, mask_matrix, gamma)

    # --- Pallas kernel 2: CRF forward + Viterbi decode (real-C recurrence) ---
    trans_t_cc = params["crf_trans"].T                    # (C, C)  [next, prev]
    trans_flat = params["crf_trans"].reshape(1, C * C)    # for the gold score
    start_c = params["crf_start"].reshape(1, C)
    end_c = params["crf_end"].reshape(1, C)

    llh_rows, dtags_sb = crf_forward_decode(
        sequence_emissions, tag_matrix, mask_matrix,
        trans_t_cc, trans_flat, start_c, end_c)

    # reduction='token_mean'
    llh = jnp.sum(llh_rows) / jnp.maximum(jnp.sum(mask_matrix), 1.0)
    loss_crf_fc = -llh
    loss = loss_crf_fc + loss_ft_fc
    return dtags_sb.T, loss, loss_crf_fc, loss_ft_fc


def generator_forward(params, input_ids, attention_mask, token_type_ids,
                      in_mask_matrix, in_tag_matrix, seq_len,
                      fine_tune=False, gamma=None):
    del fine_tune
    dtags, loss, loss_crf_fc, loss_ft_fc = _generator_compute(
        params, input_ids, attention_mask, token_type_ids,
        jnp.asarray(in_mask_matrix), jnp.asarray(in_tag_matrix),
        seq_len=seq_len, gamma=gamma)
    jax.block_until_ready(loss)                  # single host sync after jit
    decode_result = jax.device_get(dtags).tolist()
    return decode_result, loss, float(loss_crf_fc), float(loss_ft_fc)


def init_params(key, vocab, max_pos, E, C):
    ks = jax.random.split(key, 8)
    return {
        "word_emb": jax.random.normal(ks[0], (vocab, E), jnp.float32) * 0.02,
        "pos_emb": jax.random.normal(ks[1], (max_pos, E), jnp.float32) * 0.02,
        "type_emb": jax.random.normal(ks[2], (2, E), jnp.float32) * 0.02,
        "ln_g": jnp.ones((E,), jnp.float32),
        "ln_b": jnp.zeros((E,), jnp.float32),
        "fc_w": jax.random.normal(ks[3], (C, E), jnp.float32) / jnp.sqrt(E),
        "fc_b": jnp.zeros((C,), jnp.float32),
        "crf_trans": jax.random.normal(ks[4], (C, C), jnp.float32) * 0.1,
        "crf_start": jax.random.normal(ks[5], (C,), jnp.float32) * 0.1,
        "crf_end": jax.random.normal(ks[6], (C,), jnp.float32) * 0.1,
    }


if __name__ == "__main__":
    B, S, E, C = 2, 8, 32, 8     # batch, seq_len, embedding_size, num_class
    VOCAB, MAX_POS = 100, 64

    key = jax.random.PRNGKey(0)
    kp, k_ids, k_tags = jax.random.split(key, 3)
    params = init_params(kp, VOCAB, MAX_POS, E, C)

    input_ids = jax.random.randint(k_ids, (B, S), 0, VOCAB, dtype=jnp.int32)
    attention_mask = jnp.ones((B, S), jnp.int32)
    token_type_ids = jnp.zeros((B, S), jnp.int32)
    in_mask_matrix = jnp.ones((B, S), jnp.int32)
    in_tag_matrix = jax.random.randint(k_tags, (B, S), 0, C, dtype=jnp.int32)

    decode_result, loss, loss_crf_fc, loss_ft_fc = generator_forward(
        params, input_ids, attention_mask, token_type_ids,
        in_mask_matrix, in_tag_matrix, S, gamma=None)

    jax.block_until_ready(loss)
    assert jnp.isfinite(loss)
    assert len(decode_result) == B and len(decode_result[0]) == S
    assert all(0 <= t < C for row in decode_result for t in row)
    print("KERNEL_OK")
</pallas_src>

<mosaic_0001>
module attributes {stable_mosaic.version = 11 : i64} {
  func.func @_fc_softmax_kernel(%arg0: i32, %arg1: memref<16x32xf32, #tpu.memory_space<vmem>>, %arg2: memref<32x128xbf16, #tpu.memory_space<vmem>>, %arg3: memref<1x128xf32, #tpu.memory_space<vmem>>, %arg4: memref<16x128xf32, #tpu.memory_space<vmem>>, %arg5: memref<16x128xf32, #tpu.memory_space<vmem>>) attributes {dimension_semantics = [#tpu.dimension_semantics<parallel>], iteration_bounds = array<i64: 1>, scalar_prefetch = 0 : i64, scratch_operands = 0 : i64, tpu.core_type = #tpu.core_type<tc>, window_params = [{transform_indices = @transform_0, window_bounds = array<i64: 16, 32>}, {pipeline_mode = #tpu.pipeline_mode<synchronous>, transform_indices = @transform_1, window_bounds = array<i64: 32, 128>}, {pipeline_mode = #tpu.pipeline_mode<synchronous>, transform_indices = @transform_2, window_bounds = array<i64: 1, 128>}, {transform_indices = @transform_3, window_bounds = array<i64: 16, 128>}, {transform_indices = @transform_4, window_bounds = array<i64: 16, 128>}]} {
    %c0 = arith.constant 0 : index
    %c0_0 = arith.constant 0 : index
    %0 = vector.load %arg1[%c0, %c0_0] : memref<16x32xf32, #tpu.memory_space<vmem>>, vector<16x32xf32>
    %1 = arith.truncf %0 : vector<16x32xf32> to vector<16x32xbf16>
    %c0_1 = arith.constant 0 : index
    %c0_2 = arith.constant 0 : index
    %2 = vector.load %arg2[%c0_1, %c0_2] : memref<32x128xbf16, #tpu.memory_space<vmem>>, vector<32x128xbf16>
    %cst = arith.constant dense<0.000000e+00> : vector<16x128xf32>
    %3 = tpu.matmul %1, %2, %cst {dimension_numbers = #tpu.dot_dimension_numbers<[1], [0], [0], [1], [0, 0, 1, 1], [], []>} : vector<16x32xbf16>, vector<32x128xbf16>, vector<16x128xf32> -> vector<16x128xf32>
    %c0_3 = arith.constant 0 : index
    %c0_4 = arith.constant 0 : index
    %4 = vector.load %arg3[%c0_3, %c0_4] : memref<1x128xf32, #tpu.memory_space<vmem>>, vector<1x128xf32>
    %5 = vector.broadcast %4 : vector<1x128xf32> to vector<16x128xf32>
    %6 = arith.addf %3, %5 : vector<16x128xf32>
    %c0_5 = arith.constant 0 : index
    %c0_6 = arith.constant 0 : index
    %7 = vector.load %arg4[%c0_5, %c0_6] : memref<16x128xf32, #tpu.memory_space<vmem>>, vector<16x128xf32>
    tpu.vector_store %arg4[%c0_5, %c0_6], %6 {strides = array<i32>} : memref<16x128xf32, #tpu.memory_space<vmem>>, vector<16x128xf32>,
    %cst_7 = arith.constant dense<0xFF800000> : vector<16xf32>
    %8 = vector.multi_reduction <maximumf>, %6, %cst_7 [1] : vector<16x128xf32> to vector<16xf32>
    %9 = vector.shape_cast %8 : vector<16xf32> to vector<16x1xf32>
    %10 = vector.broadcast %9 : vector<16x1xf32> to vector<16x128xf32>
    %11 = arith.subf %6, %10 : vector<16x128xf32>
    %12 = math.exp %11 : vector<16x128xf32>
    %cst_8 = arith.constant dense<0.000000e+00> : vector<16xf32>
    %13 = vector.multi_reduction <add>, %12, %cst_8 [1] : vector<16x128xf32> to vector<16xf32>
    %14 = vector.shape_cast %13 : vector<16xf32> to vector<16x1xf32>
    %15 = tpu.reciprocal %14 {approx = true} : vector<16x1xf32> -> vector<16x1xf32>
    %16 = vector.broadcast %15 : vector<16x1xf32> to vector<16x128xf32>
    %17 = arith.mulf %12, %16 : vector<16x128xf32>
    %c0_9 = arith.constant 0 : index
    %c0_10 = arith.constant 0 : index
    %18 = vector.load %arg5[%c0_9, %c0_10] : memref<16x128xf32, #tpu.memory_space<vmem>>, vector<16x128xf32>
    tpu.vector_store %arg5[%c0_9, %c0_10], %17 {strides = array<i32>} : memref<16x128xf32, #tpu.memory_space<vmem>>, vector<16x128xf32>,
    return
  }
  func.func @transform_0(%arg0: i32) -> (i32, i32) {
    %c0_i32 = arith.constant 0 : i32
    %c0_i32_0 = arith.constant 0 : i32
    return %arg0, %c0_i32 : i32, i32
  }
  func.func @transform_1(%arg0: i32) -> (i32, i32) {
    %c0_i32 = arith.constant 0 : i32
    %c0_i32_0 = arith.constant 0 : i32
    %c0_i32_1 = arith.constant 0 : i32
    return %c0_i32, %c0_i32_0 : i32, i32
  }
  func.func @transform_2(%arg0: i32) -> (i32, i32) {
    %c0_i32 = arith.constant 0 : i32
    %c0_i32_0 = arith.constant 0 : i32
    %c0_i32_1 = arith.constant 0 : i32
    return %c0_i32, %c0_i32_0 : i32, i32
  }
  func.func @transform_3(%arg0: i32) -> (i32, i32) {
    %c0_i32 = arith.constant 0 : i32
    %c0_i32_0 = arith.constant 0 : i32
    return %arg0, %c0_i32 : i32, i32
  }
  func.func @transform_4(%arg0: i32) -> (i32, i32) {
    %c0_i32 = arith.constant 0 : i32
    %c0_i32_0 = arith.constant 0 : i32
    return %arg0, %c0_i32 : i32, i32
  }
}

module attributes {stable_mosaic.version = 11 : i64} {
  func.func @_crf_kernel(%arg0: i32, %arg1: memref<8x8x128xf32, #tpu.memory_space<vmem>>, %arg2: memref<8x8xi32, #tpu.memory_space<vmem>>, %arg3: memref<8x8xf32, #tpu.memory_space<vmem>>, %arg4: memref<8x8xf32, #tpu.memory_space<vmem>>, %arg5: memref<1x64xf32, #tpu.memory_space<vmem>>, %arg6: memref<1x8xf32, #tpu.memory_space<vmem>>, %arg7: memref<1x8xf32, #tpu.memory_space<vmem>>, %arg8: memref<8x1xf32, #tpu.memory_space<vmem>>, %arg9: memref<8x8x1xi32, #tpu.memory_space<vmem>>, %arg10: memref<8x8x8xi32, #tpu.memory_space<vmem>>) attributes {dimension_semantics = [#tpu.dimension_semantics<parallel>], iteration_bounds = array<i64: 1>, scalar_prefetch = 0 : i64, scratch_operands = 1 : i64, tpu.core_type = #tpu.core_type<tc>, window_params = [{transform_indices = @transform_0, window_bounds = array<i64: 8, 8, 128>}, {pipeline_mode = #tpu.pipeline_mode<synchronous>, transform_indices = @transform_1, window_bounds = array<i64: 8, 8>}, {pipeline_mode = #tpu.pipeline_mode<synchronous>, transform_indices = @transform_2, window_bounds = array<i64: 8, 8>}, {pipeline_mode = #tpu.pipeline_mode<synchronous>, transform_indices = @transform_3, window_bounds = array<i64: 8, 8>}, {pipeline_mode = #tpu.pipeline_mode<synchronous>, transform_indices = @transform_4, window_bounds = array<i64: 1, 64>}, {pipeline_mode = #tpu.pipeline_mode<synchronous>, transform_indices = @transform_5, window_bounds = array<i64: 1, 8>}, {pipeline_mode = #tpu.pipeline_mode<synchronous>, transform_indices = @transform_6, window_bounds = array<i64: 1, 8>}, {transform_indices = @transform_7, window_bounds = array<i64: 8, 1>}, {transform_indices = @transform_8, window_bounds = array<i64: 8, 8, 1>}]} {
    %c0 = arith.constant 0 : index
    %c0_0 = arith.constant 0 : index
    %0 = vector.load %arg4[%c0, %c0_0] : memref<8x8xf32, #tpu.memory_space<vmem>>, vector<8x8xf32>
    %c0_1 = arith.constant 0 : index
    %c0_2 = arith.constant 0 : index
    %1 = vector.load %arg5[%c0_1, %c0_2] : memref<1x64xf32, #tpu.memory_space<vmem>>, vector<1x64xf32>
    %c0_3 = arith.constant 0 : index
    %c0_4 = arith.constant 0 : index
    %2 = vector.load %arg6[%c0_3, %c0_4] : memref<1x8xf32, #tpu.memory_space<vmem>>, vector<1x8xf32>
    %c0_5 = arith.constant 0 : index
    %c0_6 = arith.constant 0 : index
    %3 = vector.load %arg7[%c0_5, %c0_6] : memref<1x8xf32, #tpu.memory_space<vmem>>, vector<1x8xf32>
    %4 = tpu.iota {dimensions = array<i32: 1>} : vector<8x8xi32>
    %5 = tpu.iota {dimensions = array<i32: 0>} : vector<8x8xi32>
    %c8_i32 = arith.constant 8 : i32
    %6 = arith.muli %arg0, %c8_i32 : i32
    %7 = vector.broadcast %6 : i32 to vector<8x8xi32>
    %8 = arith.addi %7, %5 : vector<8x8xi32>
    %9 = arith.cmpi eq, %4, %8 : vector<8x8xi32>
    %10 = tpu.iota {dimensions = array<i32: 1>} : vector<8x8xi32>
    %11 = tpu.iota {dimensions = array<i32: 1>} : vector<8x64xi32>
    %12 = tpu.iota {dimensions = array<i32: 2>} : vector<8x8x8xi32>
    %13 = tpu.iota {dimensions = array<i32: 1>} : vector<8x8xi32>
    %c0_7 = arith.constant 0 : index
    %c0_8 = arith.constant 0 : index
    %14 = vector.load %arg2[%c0_7, %c0_8] : memref<8x8xi32, #tpu.memory_space<vmem>>, vector<1x8xi32>
    %c0_i32 = arith.constant 0 : i32
    %15 = vector.shape_cast %14 : vector<1x8xi32> to vector<1x8xi32>
    %16 = vector.broadcast %15 : vector<1x8xi32> to vector<8x8xi32>
    %17 = vector.broadcast %c0_i32 : i32 to vector<8x8xi32>
    %18 = arith.select %9, %16, %17 : vector<8x8xi1>, vector<8x8xi32>
    %cst = arith.constant dense<0> : vector<8xi32>
    %19 = vector.multi_reduction <add>, %18, %cst [1] : vector<8x8xi32> to vector<8xi32>
    %20 = vector.shape_cast %19 : vector<8xi32> to vector<8x1xi32>
    %c0_9 = arith.constant 0 : index
    %c0_10 = arith.constant 0 : index
    %c0_11 = arith.constant 0 : index
    %21 = vector.load %arg1[%c0_9, %c0_10, %c0_11] : memref<8x8x128xf32, #tpu.memory_space<vmem>>, vector<1x8x128xf32>
    %22 = vector.shape_cast %21 : vector<1x8x128xf32> to vector<8x128xf32>
    %23 = vector.extract_strided_slice %22 {offsets = [0, 0], sizes = [8, 8], strides = [1, 1]} : vector<8x128xf32> to vector<8x8xf32>
    %24 = vector.broadcast %20 : vector<8x1xi32> to vector<8x8xi32>
    %25 = arith.cmpi eq, %10, %24 : vector<8x8xi32>
    %cst_12 = arith.constant 0.000000e+00 : f32
    %26 = vector.shape_cast %2 : vector<1x8xf32> to vector<1x8xf32>
    %27 = vector.broadcast %26 : vector<1x8xf32> to vector<8x8xf32>
    %28 = vector.broadcast %cst_12 : f32 to vector<8x8xf32>
    %29 = arith.select %25, %27, %28 : vector<8x8xi1>, vector<8x8xf32>
    %cst_13 = arith.constant dense<0.000000e+00> : vector<8xf32>
    %30 = vector.multi_reduction <add>, %29, %cst_13 [1] : vector<8x8xf32> to vector<8xf32>
    %31 = vector.shape_cast %30 : vector<8xf32> to vector<8x1xf32>
    %cst_14 = arith.constant 0.000000e+00 : f32
    %32 = vector.broadcast %cst_14 : f32 to vector<8x8xf32>
    %33 = arith.select %25, %23, %32 : vector<8x8xi1>, vector<8x8xf32>
    %cst_15 = arith.constant dense<0.000000e+00> : vector<8xf32>
    %34 = vector.multi_reduction <add>, %33, %cst_15 [1] : vector<8x8xf32> to vector<8xf32>
    %35 = vector.shape_cast %34 : vector<8xf32> to vector<8x1xf32>
    %36 = arith.addf %31, %35 : vector<8x1xf32>
    %37 = vector.broadcast %2 : vector<1x8xf32> to vector<8x8xf32>
    %38 = arith.addf %37, %23 : vector<8x8xf32>
    %c1_i32 = arith.constant 1 : i32
    %c7_i32 = arith.constant 7 : i32
    %39 = arith.addi %c1_i32, %c7_i32 : i32
    %c1_i32_16 = arith.constant 1 : i32
    %40:5 = scf.for %arg11 = %c1_i32 to %39 step %c1_i32_16 iter_args(%arg12 = %38, %arg13 = %38, %arg14 = %36, %arg15 = %20, %arg16 = %20) -> (vector<8x8xf32>, vector<8x8xf32>, vector<8x1xf32>, vector<8x1xi32>, vector<8x1xi32>)  : i32 {
      %78 = arith.index_cast %arg11 : i32 to index
      %c0_33 = arith.constant 0 : index
      %c0_34 = arith.constant 0 : index
      %79 = vector.load %arg1[%78, %c0_33, %c0_34] : memref<8x8x128xf32, #tpu.memory_space<vmem>>, vector<1x8x128xf32>
      %80 = vector.shape_cast %79 : vector<1x8x128xf32> to vector<8x128xf32>
      %81 = vector.extract_strided_slice %80 {offsets = [0, 0], sizes = [8, 8], strides = [1, 1]} : vector<8x128xf32> to vector<8x8xf32>
      %82 = arith.index_cast %arg11 : i32 to index
      %c0_35 = arith.constant 0 : index
      %83 = vector.load %arg2[%82, %c0_35] : memref<8x8xi32, #tpu.memory_space<vmem>>, vector<1x8xi32>
      %c0_i32_36 = arith.constant 0 : i32
      %84 = vector.shape_cast %83 : vector<1x8xi32> to vector<1x8xi32>
      %85 = vector.broadcast %84 : vector<1x8xi32> to vector<8x8xi32>
      %86 = vector.broadcast %c0_i32_36 : i32 to vector<8x8xi32>
      %87 = arith.select %9, %85, %86 : vector<8x8xi1>, vector<8x8xi32>
      %cst_37 = arith.constant dense<0> : vector<8xi32>
      %88 = vector.multi_reduction <add>, %87, %cst_37 [1] : vector<8x8xi32> to vector<8xi32>
      %89 = vector.shape_cast %88 : vector<8xi32> to vector<8x1xi32>
      %90 = arith.index_cast %arg11 : i32 to index
      %c0_38 = arith.constant 0 : index
      %91 = vector.load %arg3[%90, %c0_38] : memref<8x8xf32, #tpu.memory_space<vmem>>, vector<1x8xf32>
      %cst_39 = arith.constant 0.000000e+00 : f32
      %92 = vector.shape_cast %91 : vector<1x8xf32> to vector<1x8xf32>
      %93 = vector.broadcast %92 : vector<1x8xf32> to vector<8x8xf32>
      %94 = vector.broadcast %cst_39 : f32 to vector<8x8xf32>
      %95 = arith.select %9, %93, %94 : vector<8x8xi1>, vector<8x8xf32>
      %cst_40 = arith.constant dense<0.000000e+00> : vector<8xf32>
      %96 = vector.multi_reduction <add>, %95, %cst_40 [1] : vector<8x8xf32> to vector<8xf32>
      %97 = vector.shape_cast %96 : vector<8xf32> to vector<8x1xf32>
      %cst_41 = arith.constant 5.000000e-01 : f32
      %98 = vector.broadcast %cst_41 : f32 to vector<8x1xf32>
      %99 = arith.cmpf ogt, %97, %98 : vector<8x1xf32>
      %100 = vector.broadcast %89 : vector<8x1xi32> to vector<8x8xi32>
      %101 = arith.cmpi eq, %10, %100 : vector<8x8xi32>
      %cst_42 = arith.constant 0.000000e+00 : f32
      %102 = vector.broadcast %cst_42 : f32 to vector<8x8xf32>
      %103 = arith.select %101, %81, %102 : vector<8x8xi1>, vector<8x8xf32>
      %cst_43 = arith.constant dense<0.000000e+00> : vector<8xf32>
      %104 = vector.multi_reduction <add>, %103, %cst_43 [1] : vector<8x8xf32> to vector<8xf32>
      %105 = vector.shape_cast %104 : vector<8xf32> to vector<8x1xf32>
      %c8_i32_44 = arith.constant 8 : i32
      %106 = vector.broadcast %c8_i32_44 : i32 to vector<8x1xi32>
      %107 = arith.muli %arg15, %106 : vector<8x1xi32>
      %108 = arith.addi %107, %89 : vector<8x1xi32>
      %109 = vector.broadcast %108 : vector<8x1xi32> to vector<8x64xi32>
      %110 = arith.cmpi eq, %11, %109 : vector<8x64xi32>
      %cst_45 = arith.constant 0.000000e+00 : f32
      %111 = vector.shape_cast %1 : vector<1x64xf32> to vector<1x64xf32>
      %112 = vector.broadcast %111 : vector<1x64xf32> to vector<8x64xf32>
      %113 = vector.broadcast %cst_45 : f32 to vector<8x64xf32>
      %114 = arith.select %110, %112, %113 : vector<8x64xi1>, vector<8x64xf32>
      %cst_46 = arith.constant dense<0.000000e+00> : vector<8xf32>
      %115 = vector.multi_reduction <add>, %114, %cst_46 [1] : vector<8x64xf32> to vector<8xf32>
      %116 = vector.shape_cast %115 : vector<8xf32> to vector<8x1xf32>
      %117 = arith.addf %105, %116 : vector<8x1xf32>
      %118 = arith.mulf %97, %117 : vector<8x1xf32>
      %119 = arith.addf %arg14, %118 : vector<8x1xf32>
      %120 = arith.select %99, %89, %arg16 : vector<8x1xi1>, vector<8x1xi32>
      %121 = vector.shape_cast %arg12 : vector<8x8xf32> to vector<8x1x8xf32>
      %122 = vector.shape_cast %0 : vector<8x8xf32> to vector<1x8x8xf32>
      %123 = vector.broadcast %121 : vector<8x1x8xf32> to vector<8x8x8xf32>
      %124 = vector.broadcast %122 : vector<1x8x8xf32> to vector<8x8x8xf32>
      %125 = arith.addf %123, %124 : vector<8x8x8xf32>
      %cst_47 = arith.constant dense<0xFF800000> : vector<8x8xf32>
      %126 = vector.multi_reduction <maximumf>, %125, %cst_47 [2] : vector<8x8x8xf32> to vector<8x8xf32>
      %127 = vector.shape_cast %126 : vector<8x8xf32> to vector<8x8x1xf32>
      %128 = vector.broadcast %127 : vector<8x8x1xf32> to vector<8x8x8xf32>
      %129 = arith.subf %125, %128 : vector<8x8x8xf32>
      %130 = math.exp %129 : vector<8x8x8xf32>
      %cst_48 = arith.constant dense<0.000000e+00> : vector<8x8xf32>
      %131 = vector.multi_reduction <add>, %130, %cst_48 [2] : vector<8x8x8xf32> to vector<8x8xf32>
      %132 = math.log %131 : vector<8x8xf32>
      %133 = arith.addf %126, %132 : vector<8x8xf32>
      %134 = arith.addf %133, %81 : vector<8x8xf32>
      %135 = vector.shape_cast %99 : vector<8x1xi1> to vector<8x1xi1>
      %136 = vector.broadcast %135 : vector<8x1xi1> to vector<8x8xi1>
      %137 = arith.select %136, %134, %arg12 : vector<8x8xi1>, vector<8x8xf32>
      %138 = vector.shape_cast %arg13 : vector<8x8xf32> to vector<8x1x8xf32>
      %139 = vector.shape_cast %0 : vector<8x8xf32> to vector<1x8x8xf32>
      %140 = vector.broadcast %138 : vector<8x1x8xf32> to vector<8x8x8xf32>
      %141 = vector.broadcast %139 : vector<1x8x8xf32> to vector<8x8x8xf32>
      %142 = arith.addf %140, %141 : vector<8x8x8xf32>
      %cst_49 = arith.constant dense<0xFF800000> : vector<8x8xf32>
      %143 = vector.multi_reduction <maximumf>, %142, %cst_49 [2] : vector<8x8x8xf32> to vector<8x8xf32>
      %144 = vector.shape_cast %143 : vector<8x8xf32> to vector<8x8x1xf32>
      %145 = vector.broadcast %144 : vector<8x8x1xf32> to vector<8x8x8xf32>
      %146 = arith.cmpf oge, %142, %145 : vector<8x8x8xf32>
      %c8_i32_50 = arith.constant 8 : i32
      %147 = vector.broadcast %c8_i32_50 : i32 to vector<8x8x8xi32>
      %148 = arith.select %146, %12, %147 : vector<8x8x8xi1>, vector<8x8x8xi32>
      %cst_51 = arith.constant dense<2147483647> : vector<8x8xi32>
      %149 = vector.multi_reduction <minsi>, %148, %cst_51 [2] : vector<8x8x8xi32> to vector<8x8xi32>
      %150 = vector.shape_cast %99 : vector<8x1xi1> to vector<8x1xi1>
      %151 = vector.broadcast %150 : vector<8x1xi1> to vector<8x8xi1>
      %152 = arith.select %151, %149, %13 : vector<8x8xi1>, vector<8x8xi32>
      %153 = arith.index_cast %arg11 : i32 to index
      %c0_52 = arith.constant 0 : index
      %c0_53 = arith.constant 0 : index
      %154 = vector.load %arg10[%153, %c0_52, %c0_53] : memref<8x8x8xi32, #tpu.memory_space<vmem>>, vector<1x8x8xi32>
      %155 = vector.shape_cast %154 : vector<1x8x8xi32> to vector<8x8xi32>
      %156 = vector.shape_cast %152 : vector<8x8xi32> to vector<1x8x8xi32>
      tpu.vector_store %arg10[%153, %c0_52, %c0_53], %156 {strides = array<i32>} : memref<8x8x8xi32, #tpu.memory_space<vmem>>, vector<1x8x8xi32>,
      %157 = arith.addf %143, %81 : vector<8x8xf32>
      %158 = vector.shape_cast %99 : vector<8x1xi1> to vector<8x1xi1>
      %159 = vector.broadcast %158 : vector<8x1xi1> to vector<8x8xi1>
      %160 = arith.select %159, %157, %arg13 : vector<8x8xi1>, vector<8x8xf32>
      scf.yield %137, %160, %119, %89, %120 : vector<8x8xf32>, vector<8x8xf32>, vector<8x1xf32>, vector<8x1xi32>, vector<8x1xi32>
    }
    %c7_i32_17 = arith.constant 7 : i32
    %41 = vector.broadcast %40#4 : vector<8x1xi32> to vector<8x8xi32>
    %42 = arith.cmpi eq, %10, %41 : vector<8x8xi32>
    %cst_18 = arith.constant 0.000000e+00 : f32
    %43 = vector.shape_cast %3 : vector<1x8xf32> to vector<1x8xf32>
    %44 = vector.broadcast %43 : vector<1x8xf32> to vector<8x8xf32>
    %45 = vector.broadcast %cst_18 : f32 to vector<8x8xf32>
    %46 = arith.select %42, %44, %45 : vector<8x8xi1>, vector<8x8xf32>
    %cst_19 = arith.constant dense<0.000000e+00> : vector<8xf32>
    %47 = vector.multi_reduction <add>, %46, %cst_19 [1] : vector<8x8xf32> to vector<8xf32>
    %48 = vector.shape_cast %47 : vector<8xf32> to vector<8x1xf32>
    %49 = arith.addf %40#2, %48 : vector<8x1xf32>
    %50 = vector.broadcast %3 : vector<1x8xf32> to vector<8x8xf32>
    %51 = arith.addf %40#0, %50 : vector<8x8xf32>
    %cst_20 = arith.constant dense<0xFF800000> : vector<8xf32>
    %52 = vector.multi_reduction <maximumf>, %51, %cst_20 [1] : vector<8x8xf32> to vector<8xf32>
    %53 = vector.shape_cast %52 : vector<8xf32> to vector<8x1xf32>
    %54 = vector.broadcast %53 : vector<8x1xf32> to vector<8x8xf32>
    %55 = arith.subf %51, %54 : vector<8x8xf32>
    %56 = math.exp %55 : vector<8x8xf32>
    %cst_21 = arith.constant dense<0.000000e+00> : vector<8xf32>
    %57 = vector.multi_reduction <add>, %56, %cst_21 [1] : vector<8x8xf32> to vector<8xf32>
    %58 = vector.shape_cast %57 : vector<8xf32> to vector<8x1xf32>
    %59 = math.log %58 : vector<8x1xf32>
    %60 = arith.addf %53, %59 : vector<8x1xf32>
    %61 = arith.subf %49, %60 : vector<8x1xf32>
    %c0_22 = arith.constant 0 : index
    %c0_23 = arith.constant 0 : index
    %62 = vector.load %arg8[%c0_22, %c0_23] : memref<8x1xf32, #tpu.memory_space<vmem>>, vector<8x1xf32>
    tpu.vector_store %arg8[%c0_22, %c0_23], %61 {strides = array<i32>} : memref<8x1xf32, #tpu.memory_space<vmem>>, vector<8x1xf32>,
    %63 = vector.broadcast %3 : vector<1x8xf32> to vector<8x8xf32>
    %64 = arith.addf %40#1, %63 : vector<8x8xf32>
    %cst_24 = arith.constant dense<0xFF800000> : vector<8xf32>
    %65 = vector.multi_reduction <maximumf>, %64, %cst_24 [1] : vector<8x8xf32> to vector<8xf32>
    %66 = vector.shape_cast %65 : vector<8xf32> to vector<8x1xf32>
    %67 = vector.broadcast %66 : vector<8x1xf32> to vector<8x8xf32>
    %68 = arith.cmpf oge, %64, %67 : vector<8x8xf32>
    %c8_i32_25 = arith.constant 8 : i32
    %69 = vector.broadcast %c8_i32_25 : i32 to vector<8x8xi32>
    %70 = arith.select %68, %10, %69 : vector<8x8xi1>, vector<8x8xi32>
    %cst_26 = arith.constant dense<2147483647> : vector<8xi32>
    %71 = vector.multi_reduction <minsi>, %70, %cst_26 [1] : vector<8x8xi32> to vector<8xi32>
    %72 = vector.shape_cast %71 : vector<8xi32> to vector<8x1xi32>
    %c7 = arith.constant 7 : index
    %c0_27 = arith.constant 0 : index
    %c0_28 = arith.constant 0 : index
    %73 = vector.load %arg9[%c7, %c0_27, %c0_28] : memref<8x8x1xi32, #tpu.memory_space<vmem>>, vector<1x8x1xi32>
    %74 = vector.shape_cast %73 : vector<1x8x1xi32> to vector<8x1xi32>
    %75 = vector.shape_cast %72 : vector<8x1xi32> to vector<1x8x1xi32>
    tpu.vector_store %arg9[%c7, %c0_27, %c0_28], %75 {strides = array<i32>} : memref<8x8x1xi32, #tpu.memory_space<vmem>>, vector<1x8x1xi32>,
    %c0_i32_29 = arith.constant 0 : i32
    %c7_i32_30 = arith.constant 7 : i32
    %76 = arith.addi %c0_i32_29, %c7_i32_30 : i32
    %c1_i32_31 = arith.constant 1 : i32
    %77 = scf.for %arg11 = %c0_i32_29 to %76 step %c1_i32_31 iter_args(%arg12 = %71) -> (vector<8xi32>)  : i32 {
      %c6_i32 = arith.constant 6 : i32
      %78 = arith.subi %c6_i32, %arg11 : i32
      %c1_i32_33 = arith.constant 1 : i32
      %79 = arith.addi %78, %c1_i32_33 : i32
      %80 = arith.index_cast %79 : i32 to index
      %c0_34 = arith.constant 0 : index
      %c0_35 = arith.constant 0 : index
      %81 = vector.load %arg10[%80, %c0_34, %c0_35] : memref<8x8x8xi32, #tpu.memory_space<vmem>>, vector<1x8x8xi32>
      %82 = vector.shape_cast %81 : vector<1x8x8xi32> to vector<8x8xi32>
      %83 = vector.shape_cast %arg12 : vector<8xi32> to vector<8x1xi32>
      %84 = vector.broadcast %83 : vector<8x1xi32> to vector<8x8xi32>
      %85 = arith.cmpi eq, %10, %84 : vector<8x8xi32>
      %c0_i32_36 = arith.constant 0 : i32
      %86 = vector.broadcast %c0_i32_36 : i32 to vector<8x8xi32>
      %87 = arith.select %85, %82, %86 : vector<8x8xi1>, vector<8x8xi32>
      %cst_37 = arith.constant dense<0> : vector<8xi32>
      %88 = vector.multi_reduction <add>, %87, %cst_37 [1] : vector<8x8xi32> to vector<8xi32>
      %89 = vector.shape_cast %88 : vector<8xi32> to vector<8x1xi32>
      %90 = arith.index_cast %78 : i32 to index
      %c0_38 = arith.constant 0 : index
      %c0_39 = arith.constant 0 : index
      %91 = vector.load %arg9[%90, %c0_38, %c0_39] : memref<8x8x1xi32, #tpu.memory_space<vmem>>, vector<1x8x1xi32>
      %92 = vector.shape_cast %91 : vector<1x8x1xi32> to vector<8x1xi32>
      %93 = vector.shape_cast %89 : vector<8x1xi32> to vector<1x8x1xi32>
      tpu.vector_store %arg9[%90, %c0_38, %c0_39], %93 {strides = array<i32>} : memref<8x8x1xi32, #tpu.memory_space<vmem>>, vector<1x8x1xi32>,
      scf.yield %88 : vector<8xi32>
    }
    %c7_i32_32 = arith.constant 7 : i32
    return
  }
  func.func @transform_0(%arg0: i32) -> (i32, i32, i32) {
    %c0_i32 = arith.constant 0 : i32
    %c0_i32_0 = arith.constant 0 : i32
    %c0_i32_1 = arith.constant 0 : i32
    return %c0_i32, %arg0, %c0_i32_0 : i32, i32, i32
  }
  func.func @transform_1(%arg0: i32) -> (i32, i32) {
    %c0_i32 = arith.constant 0 : i32
    %c0_i32_0 = arith.constant 0 : i32
    %c0_i32_1 = arith.constant 0 : i32
    return %c0_i32, %c0_i32_0 : i32, i32
  }
  func.func @transform_2(%arg0: i32) -> (i32, i32) {
    %c0_i32 = arith.constant 0 : i32
    %c0_i32_0 = arith.constant 0 : i32
    %c0_i32_1 = arith.constant 0 : i32
    return %c0_i32, %c0_i32_0 : i32, i32
  }
  func.func @transform_3(%arg0: i32) -> (i32, i32) {
    %c0_i32 = arith.constant 0 : i32
    %c0_i32_0 = arith.constant 0 : i32
    %c0_i32_1 = arith.constant 0 : i32
    return %c0_i32, %c0_i32_0 : i32, i32
  }
  func.func @transform_4(%arg0: i32) -> (i32, i32) {
    %c0_i32 = arith.constant 0 : i32
    %c0_i32_0 = arith.constant 0 : i32
    %c0_i32_1 = arith.constant 0 : i32
    return %c0_i32, %c0_i32_0 : i32, i32
  }
  func.func @transform_5(%arg0: i32) -> (i32, i32) {
    %c0_i32 = arith.constant 0 : i32
    %c0_i32_0 = arith.constant 0 : i32
    %c0_i32_1 = arith.constant 0 : i32
    return %c0_i32, %c0_i32_0 : i32, i32
  }
  func.func @transform_6(%arg0: i32) -> (i32, i32) {
    %c0_i32 = arith.constant 0 : i32
    %c0_i32_0 = arith.constant 0 : i32
    %c0_i32_1 = arith.constant 0 : i32
    return %c0_i32, %c0_i32_0 : i32, i32
  }
  func.func @transform_7(%arg0: i32) -> (i32, i32) {
    %c0_i32 = arith.constant 0 : i32
    %c0_i32_0 = arith.constant 0 : i32
    return %arg0, %c0_i32 : i32, i32
  }
  func.func @transform_8(%arg0: i32) -> (i32, i32, i32) {
    %c0_i32 = arith.constant 0 : i32
    %c0_i32_0 = arith.constant 0 : i32
    %c0_i32_1 = arith.constant 0 : i32
    return %c0_i32, %arg0, %c0_i32_0 : i32, i32, i32
  }
}

</mosaic_0001>

<bundles_post_ra>
// kernel: _generator_compute.2
= control target key start
LH: loop header
LB: loop body
LE: loop exit
PB: predicated region body
PF: predicated region fallthrough
CT: control target
= control target key end

     0   :  { %v145_v0 = vmov 0.0   ;;  %vm146_vm0 = vmmov 0   ;;  %vm43_vm1 = vcmask 261120   ;;  %s199_s1 = inlined_call_operand.vmem [shape: bf16[32,128], index: 1, kind: input, shape index: {}]   ;;  %s200_s0 = inlined_call_operand.vmem [shape: f32[16,32], index: 0, kind: input, shape index: {}]   ;;  %s201_s2 = inlined_call_operand.vmem [shape: f32[1,128], index: 2, kind: input, shape index: {}]   ;;  %s202_s3 = inlined_call_operand.vmem [shape: f32[16,128], index: 3, kind: output, shape index: {0}]   ;;  %s203_s4 = inlined_call_operand.vmem [shape: f32[16,128], index: 4, kind: output, shape index: {1}]  }
   0x1   :  { %125 = vmatprep.subr.bf16.mxu0 %v145_v0  ;;  %v135_v1 = vld [vmem:[%s199_s1] sm:$0xff]   ;;  %129 = vmatprep.mubr.msk.bf16.mxu0 %vm146_vm0, %v145_v0  ;;  %v136_v2 = vld [vmem:[%s199_s1 + $0x8] sm:$0xff]  }
   0x2   :  { %126 = vmatpush3.bf16.msra.mxu0 %v135_v1  ;;  %v17_v3 = vld [vmem:[%s200_s0] sm:$0xff]  ;;  %v18_v4 = vld [vmem:[%s200_s0 + $0x8] sm:$0xff] }
   0x3   :  { %127 = vmatprep.subr.bf16.mxu0 %v145_v0  ;;  %v19_v5 = vpack.c.bf16 %v18_v4, %v17_v3  ;;  %v118_v6 = vld [vmem:[%s201_s2] ss:$0 sm:$0xff] }
   0x6   :  { %128 = vmatpush3.bf16.msra.mxu0 %v136_v2 }
   0x9   :  { %130 = vmatmul.mubr.msk.bf16.vlgmr.msra.gmra.mrb[0].mxu0 %vm43_vm1, %v19_v5 }
  0xdc   :  { %v81_v7 = vpop.f32.mrb[0].mxu0 }
  0xdd   :  { %v82_v8 = vadd.f32 %v118_v6, %v81_v7  ;;  %v131_v9 = vpop.f32.mrb[1].mxu0 }
  0xde   :  { %v84_v10 = vpop.f32.mrb[2].mxu0 }
  0xdf   :  { %88 = vst [vmem:[%s202_s3] sm:$0xff] %v82_v8  ;;  %v85_v11 = vadd.f32 %v118_v6, %v84_v10  ;;  %90 = vmax.xlane.f32.xlu0 %v82_v8  ;;  %v132_v12 = vpop.f32.mrb[3].mxu0 }
  0xe1   :  { %89 = vst [vmem:[%s202_s3 + $0x8] sm:$0xff] %v85_v11 }
  0xe3   :  { %92 = vmax.xlane.f32.xlu0 %v85_v11 }
 0x16c   :  { %v91_v13 = vpop.xlane.xlu0 %90 }
 0x16d   :  { %v94_v14 = vsub.f32 %v82_v8, %v91_v13 }
 0x16f   :  { %v96_v15 = vmul.f32 1.442695, %v94_v14 }
 0x170   :  { %v93_v16 = vpop.xlane.xlu0 %92 }
 0x171   :  { %137 = vpow2.f32 %v96_v15  ;;  %v95_v17 = vsub.f32 %v85_v11, %v93_v16 }
 0x173   :  { %v98_v18 = vmul.f32 1.442695, %v95_v17 }
 0x175   :  { %139 = vpow2.f32 %v98_v18 }
 0x17b   :  { %v138_v19 = vpop.eup %137 }
 0x17c   :  { %100 = vadd.xlane.f32.xlu1 %v138_v19 }
 0x17f   :  { %v140_v20 = vpop.eup %139 }
 0x180   :  { %102 = vadd.xlane.f32.xlu1 %v140_v20 }
 0x209   :  { %v101_v21 = vpop.xlane.xlu1 %100 }
 0x20a   :  { %141 = vrcp.f32 %v101_v21 }
 0x20d   :  { %v103_v22 = vpop.xlane.xlu1 %102 }
 0x20e   :  { %143 = vrcp.f32 %v103_v22 }
 0x214   :  { %v142_v23 = vpop.eup %141 }
 0x215   :  { %v106_v24 = vmul.f32 %v142_v23, %v138_v19 }
 0x217   :  { %108 = vst [vmem:[%s203_s4] sm:$0xff] %v106_v24 }
 0x218   :  { %v144_v25 = vpop.eup %143 }
 0x219   :  { %v107_v26 = vmul.f32 %v144_v25, %v140_v20 }
 0x21b   :  { %109 = vst [vmem:[%s203_s4 + $0x8] sm:$0xff] %v107_v26 }

// kernel: _generator_compute.3
= control target key start
LH: loop header
LB: loop body
LE: loop exit
PB: predicated region body
PF: predicated region fallthrough
CT: control target
= control target key end

     0   :  { %v32_v0 = vlaneseq  ;;  %vm46_vm0 = vcmask 64512   ;;  %s1809_s1 = inlined_call_operand.vmem [shape: s32[8,8], index: 1, kind: input, shape index: {}]   ;;  %s1810_s5 = inlined_call_operand.vmem [shape: f32[1,8], index: 5, kind: input, shape index: {}]   ;;  %s1811_s0 = inlined_call_operand.vmem [shape: f32[8,8,128], index: 0, kind: input, shape index: {}]   ;;  %s1812_s3 = inlined_call_operand.vmem [shape: f32[8,8], index: 3, kind: input, shape index: {}]   ;;  %s1813_s4 = inlined_call_operand.vmem [shape: f32[1,64], index: 4, kind: input, shape index: {}]   ;;  %s1814_s6 = inlined_call_operand.vmem [shape: f32[1,8], index: 6, kind: input, shape index: {}]   ;;  %s1815_s2 = inlined_call_operand.vmem [shape: f32[8,8], index: 2, kind: input, shape index: {}]   ;;  %s1816_s7 = inlined_call_operand.vmem [shape: f32[8,1], index: 7, kind: output, shape index: {0}]   ;;  %s1817_s8 = inlined_call_operand.vmem [shape: s32[8,8,1], index: 8, kind: output, shape index: {1}]  }
   0x1   :  { %v1003_v3 = vld [vmem:[%s1809_s1] ss:$0 sm:$0xff] }
   0x2   :  { %v1228_v1 = vand.u32 127, %v32_v0  ;;  %v1230_v2 = vshrl.u32 %v32_v0, 7  ;;  %v1004_v10 = vld [vmem:[%s1810_s5] ss:$0 sm:$0xff] }
   0x3   :  { %v60_v11 = vld [vmem:[%s1811_s0] sm:$0xff] }
   0x4   :  { %vm39_vm1 = vcmp.eq.s32.totalorder %v1228_v1, %v1230_v2  ;;  %v77_v12 = vadd.f32 %v1004_v10, %v60_v11   ;;  %v1253_v23 = vld [vmem:[%s1812_s3] sm:$0xff]  ;;  %s1275_s3 = smov 1  }
   0x5   :  { %v45_v4 = vsel %vm39_vm1, %v1003_v3, 0  ;;  %v1258_v24 = vld [vmem:[%s1813_s4] ss:$0 sm:$0xff] }
   0x6   :  { %v47_v5 = vsel %vm46_vm0, %v45_v4, 0  ;;  %v1263_v25 = vld [vmem:[%s1814_s6] ss:$0 sm:$0xff]  ;;  %v1819_v30 = vmov %v77_v12 }
   0x7   :  { %v49_v6 = vshrl.u32 %v47_v5, 16  ;;  %v48_v7 = vand.u32 65535, %v47_v5 }
   0x9   :  { %v51_v8 = vcvt.s32.f32 %v49_v6  ;;  %v50_v9 = vcvt.s32.f32 %v48_v7 }
   0xb   :  { %54 = vadd.xlane.f32.xlu0 %v51_v8 }
   0xf   :  { %52 = vadd.xlane.f32.xlu0 %v50_v9 }
  0x98   :  { %v55_v13 = vpop.xlane.xlu0 %54 }
  0x99   :  { %v57_v14 = vcvt.f32.s32 %v55_v13 }
  0x9b   :  { %v58_v16 = vshll.u32 %v57_v14, 16 }
  0x9c   :  { %v53_v15 = vpop.xlane.xlu0 %52 }
  0x9d   :  { %v56_v17 = vcvt.f32.s32 %v53_v15 }
  0x9f   :  { %v59_v18 = vadd.s32 %v58_v16, %v56_v17  }
  0xa1   :  { %vm61_vm2 = vcmp.eq.s32.totalorder %v1228_v1, %v59_v18  ;;  %v1818_v29 = vmov %v59_v18 }
  0xa2   :  { %v68_v19 = vsel %vm61_vm2, %v1004_v10, 0.0  ;;  %v72_v21 = vsel %vm61_vm2, %v60_v11, 0.0 }
  0xa3   :  { %v69_v20 = vsel %vm46_vm0, %v68_v19, 0.0  ;;  %v73_v22 = vsel %vm46_vm0, %v72_v21, 0.0 }
  0xa4   :  { %70 = vadd.xlane.f32.xlu1 %v69_v20 }
  0xa8   :  { %74 = vadd.xlane.f32.xlu1 %v73_v22 }
 0x131   :  { %v71_v26 = vpop.xlane.xlu1 %70 }
 0x135   :  { %v75_v27 = vpop.xlane.xlu1 %74 }
 0x136   :  { %v76_v28 = vadd.f32 %v75_v27, %v71_v26  }
 0x137 LB: > { %v1181_v31 = vmov 1966171168   ;;  %v147_v34 = vcombine.high %v1167_v12, %v1167_v12  ;;  %v1300_v37 = vsub.s32 0, %v1230_v2  ;;  %v496_v58 = vcombine.high %v1163_v30, %v1163_v30  ;;  %s92_s16 = scalar_lea.vmem %s1809_s1, %s1171_s3  ;;  %s112_s19 = scalar_lea.vmem %s1815_s2, %s1171_s3  ;;  %s1171_s3 = sphi %s1275_s3, %s83_s3   ;;  %v1167_v12 = vphi %v77_v12, %v1826_v12   ;;  %v1163_v30 = vphi %v1819_v30, %v1825_v30   ;;  %v1159_v28 = vphi %v76_v28, %v1824_v28   ;;  %v1155_v18 = vphi %v59_v18, %v1823_v18   ;;  %v1151_v29 = vphi %v1818_v29, %v1822_v29  }
 0x138   : > { %v149_v32 = vunpack.c.l.s4 %v1181_v31  ;;  %s1005_s20 = sshll.u32 %s1171_s3, 3  ;;  %vm138_vm7 = vcmask 523264   ;;  %vm479_vm15 = vcmask 1041409   ;;  %s83_s3 = sadd.s32 1, %s1171_s3  }
 0x139   : > { %s90_s23 = scalar_lea.vmem %s1811_s0, %s1005_s20  ;;  %s793_s24 = scalar_lea.vmem [#allocation2], %s1005_s20 }
 0x13a   : > { %v150_v33 = vunpack.c.0.s8 %v149_v32  ;;  %p80_p0 = scmp.ge.s32.totalorder %s83_s3, 8  }
 0x13b   :  { %s1798_s26 = smov (%p80_p0), 0  }
 0x13c   : > { %v153_v35 = vsub.s32 %v150_v33, %v1230_v2 }
 0x13e   : > { %v154_v36 = vrot.slane %v1167_v12, %v153_v35  ;;  %v161_v38 = vrot.slane %v147_v34, %v153_v35  ;;  %v503_v39 = vrot.slane %v1163_v30, %v153_v35  ;;  %v510_v6 = vrot.slane %v496_v58, %v153_v35 }
 0x140   : > { %v170_v40 = vrot.slane %v154_v36, %v153_v35  ;;  %v177_v41 = vrot.slane %v161_v38, %v153_v35  ;;  %v163_v42 = vcombine.high %v161_v38, %v161_v38  ;;  %v519_v43 = vrot.slane %v503_v39, %v153_v35 }
 0x141   : > { %v511_v44 = vcombine.high %v503_v39, %v503_v39  ;;  %v162_v45 = vcombine.high %v154_v36, %v154_v36  ;;  %v512_v16 = vcombine.high %v510_v6, %v510_v6  ;;  %v526_v31 = vrot.slane %v510_v6, %v153_v35 }
 0x142   : > { %v199_v46 = vrot.slane %v170_v40, %v1300_v37  ;;  %v192_v47 = vcombine.high %v170_v40, %v170_v40  ;;  %v215_v48 = vrot.slane %v177_v41, %v1300_v37  ;;  %v191_v49 = vrot.slane %v163_v42, %v153_v35 }
 0x143   : > { %v548_v50 = vrot.slane %v519_v43, %v1300_v37  ;;  %v533_v51 = vrot.slane %v511_v44, %v153_v35  ;;  %v184_v52 = vrot.slane %v162_v45, %v153_v35  ;;  %v193_v63 = vcombine.high %v177_v41, %v177_v41  ;;  %v1006_v45 = vld [vmem:[%s92_s16] ss:$0 sm:$0xff] }
 0x144   : > { %v1307_v53 = vadd.f32 %v199_v46, %v1253_v23  ;;  %v207_v54 = vrot.slane %v192_v47, %v1300_v37  ;;  %v1311_v55 = vadd.f32 %v215_v48, %v1253_v23  ;;  %v219_v56 = vrot.slane %v191_v49, %v1300_v37 }
 0x145   : > { %v552_v57 = vrot.slane %v533_v51, %v1300_v37  ;;  %v194_v62 = vcombine.high %v184_v52, %v184_v52  ;;  %v1330_v4 = vadd.f32 %v548_v50, %v1253_v23  ;;  %v203_v5 = vrot.slane %v184_v52, %v1300_v37 }
 0x146   : > { %v244_v59 = vsel %vm46_vm0, %v1307_v53, -inf  ;;  %v1320_v60 = vadd.f32 %v207_v54, %v1253_v23  ;;  %v1323_v61 = vadd.f32 %v219_v56, %v1253_v23  ;;  %v256_v3 = vsel %vm46_vm0, %v1311_v55, -inf }
 0x147   : > { %245 = vmax.xlane.f32.xlu0 %v244_v59  ;;  %v1336_v8 = vadd.f32 %v552_v57, %v1253_v23  ;;  %v211_v9 = vrot.slane %v194_v62, %v1300_v37  ;;  %v195_v10 = vcombine.high %v191_v49, %v191_v49  ;;  %v593_v11 = vsel %vm46_vm0, %v1330_v4, -inf }
 0x148   : > { %v250_v0 = vsel %vm46_vm0, %v1320_v60, -inf  ;;  %v259_v7 = vsel %vm46_vm0, %v1323_v61, -inf  ;;  %v1342_v13 = vadd.f32 %v203_v5, %v1253_v23  ;;  %v223_v14 = vrot.slane %v193_v63, %v1300_v37  ;;  %v1007_v5 = vld [vmem:[%s112_s19] ss:$0 sm:$0xff] }
 0x149   : > { %251 = vmax.xlane.f32.xlu1 %v250_v0  ;;  %v541_v15 = vcombine.high %v519_v43, %v519_v43  ;;  %v596_v17 = vsel %vm46_vm0, %v1336_v8, -inf  ;;  %v1348_v19 = vadd.f32 %v211_v9, %v1253_v23  ;;  %v227_v20 = vrot.slane %v195_v10, %v1300_v37 }
 0x14a   : > { %v543_v21 = vcombine.high %v533_v51, %v533_v51  ;;  %v247_v22 = vsel %vm46_vm0, %v1342_v13, -inf  ;;  %v1354_v26 = vadd.f32 %v223_v14, %v1253_v23  ;;  %v540_v36 = vrot.slane %v512_v16, %v153_v35 }
 0x14b   : > { %257 = vmax.xlane.f32.xlu0 %v256_v3  ;;  %v556_v27 = vrot.slane %v541_v15, %v1300_v37  ;;  %v253_v32 = vsel %vm46_vm0, %v1348_v19, -inf  ;;  %v1360_v33 = vadd.f32 %v227_v20, %v1253_v23  ;;  %v564_v40 = vrot.slane %v526_v31, %v1300_v37 }
 0x14c   : > { %v560_v34 = vrot.slane %v543_v21, %v1300_v37  ;;  %v262_v38 = vsel %vm46_vm0, %v1354_v26, -inf  ;;  %v542_v41 = vcombine.high %v526_v31, %v526_v31  ;;  %v568_v43 = vrot.slane %v540_v36, %v1300_v37 }
 0x14d   : > { %260 = vmax.xlane.f32.xlu1 %v259_v7  ;;  %v1370_v39 = vadd.f32 %v556_v27, %v1253_v23  ;;  %v265_v42 = vsel %vm46_vm0, %v1360_v33, -inf  ;;  %v544_v44 = vcombine.high %v540_v36, %v540_v36  ;;  %v1382_v47 = vadd.f32 %v564_v40, %v1253_v23 }
 0x14e   : > { %v1376_v35 = vadd.f32 %v560_v34, %v1253_v23  ;;  %v572_v48 = vrot.slane %v542_v41, %v1300_v37  ;;  %v98_v49 = vsel %vm39_vm1, %v1006_v45, 0  ;;  %v1391_v51 = vadd.f32 %v568_v43, %v1253_v23 }
 0x14f   : > { %594 = vmax.xlane.f32.xlu0 %v593_v11  ;;  %v599_v46 = vsel %vm46_vm0, %v1370_v39, -inf  ;;  %v576_v52 = vrot.slane %v544_v44, %v1300_v37  ;;  %v605_v54 = vsel %vm46_vm0, %v1382_v47, -inf  ;;  %v99_v57 = vsel %vm46_vm0, %v98_v49, 0  ;;  %v1423_v11 = vld [vmem:[%s90_s23] sm:$0xff] }
 0x150   : > { %v602_v50 = vsel %vm46_vm0, %v1376_v35, -inf  ;;  %v1397_v56 = vadd.f32 %v572_v48, %v1253_v23  ;;  %v608_v58 = vsel %vm46_vm0, %v1391_v51, -inf  ;;  %v100_v62 = vand.u32 65535, %v99_v57 }
 0x151   : > { %597 = vmax.xlane.f32.xlu1 %v596_v17  ;;  %v1403_v59 = vadd.f32 %v576_v52, %v1253_v23  ;;  %v101_v0 = vshrl.u32 %v99_v57, 16  ;;  %v118_v9 = vsel %vm39_vm1, %v1007_v5, 0.0  ;;  %v344_v14 = vrot.slane %v1423_v11, %v1300_v37 }
 0x152   : > { %v611_v63 = vsel %vm46_vm0, %v1397_v56, -inf  ;;  %v102_v6 = vcvt.s32.f32 %v100_v62  ;;  %v119_v10 = vsel %vm46_vm0, %v118_v9, 0.0  ;;  %v357_v15 = vsub.s32 2, %v1230_v2 }
 0x153   : > { %248 = vmax.xlane.f32.xlu0 %v247_v22  ;;  %v614_v3 = vsel %vm46_vm0, %v1403_v59, -inf  ;;  %v103_v7 = vcvt.s32.f32 %v101_v0  ;;  %v350_v16 = vsub.s32 1, %v1230_v2  ;;  %v364_v20 = vsub.s32 3, %v1230_v2 }
 0x154   : > { %v358_v17 = vrot.slane %v1423_v11, %v357_v15  ;;  %v1182_v21 = vmov 0   ;;  %v378_v27 = vsub.s32 5, %v1230_v2  ;;  %v371_v37 = vsub.s32 4, %v1230_v2 }
 0x155   : > { %254 = vmax.xlane.f32.xlu1 %v253_v32  ;;  %1080 = vset.pattern.permute.xlu0 %v1182_v21  ;;  %v351_v22 = vrot.slane %v1423_v11, %v350_v16  ;;  %v365_v31 = vrot.slane %v1423_v11, %v364_v20  ;;  %v392_v34 = vsub.s32 7, %v1230_v2 }
 0x156   : > { %1079 = vset.pattern.permute.xlu1 %v1182_v21  ;;  %v379_v32 = vrot.slane %v1423_v11, %v378_v27  ;;  %v372_v36 = vrot.slane %v1423_v11, %v371_v37 }
 0x157   : > { %263 = vmax.xlane.f32.xlu0 %v262_v38  ;;  %v385_v38 = vsub.s32 6, %v1230_v2  ;;  %v393_v40 = vrot.slane %v1423_v11, %v392_v34  ;;  %v128_v34 = vmul.u32 8, %v1155_v18 }
 0x159   : > { %266 = vmax.xlane.f32.xlu1 %v265_v42  ;;  %v386_v41 = vrot.slane %v1423_v11, %v385_v38 }
 0x15b   : > { %600 = vmax.xlane.f32.xlu0 %v599_v46 }
 0x15d   : > { %603 = vmax.xlane.f32.xlu1 %v602_v50 }
 0x15f   : > { %606 = vmax.xlane.f32.xlu0 %v605_v54 }
 0x161   : > { %609 = vmax.xlane.f32.xlu1 %v608_v58 }
 0x163   : > { %612 = vmax.xlane.f32.xlu0 %v611_v63 }
 0x165   : > { %615 = vmax.xlane.f32.xlu1 %v614_v3 }
 0x167   : > { %104 = vadd.xlane.f32.xlu0 %v102_v6 }
 0x169   : > { %106 = vadd.xlane.f32.xlu1 %v103_v7 }
 0x16b   : > { %120 = vadd.xlane.f32.xlu0 %v119_v10 }
 0x17a   : > { %346 = vbcast.lane.b32.xlu1 %v344_v14, 256 }
 0x17e   : > { %360 = vbcast.lane.b32.xlu1 %v358_v17, 256 }
 0x181   : > { %353 = vbcast.lane.b32.xlu0 %v351_v22, 256 }
 0x182   : > { %367 = vbcast.lane.b32.xlu1 %v365_v31, 256 }
 0x185   : > { %381 = vbcast.lane.b32.xlu0 %v379_v32, 256 }
 0x186   : > { %374 = vbcast.lane.b32.xlu1 %v372_v36, 256 }
 0x189   : > { %395 = vbcast.lane.b32.xlu0 %v393_v40, 256 }
 0x18a   : > { %388 = vbcast.lane.b32.xlu1 %v386_v41, 256 }
 0x1d4   : > { %v1441_v42 = vpop.xlane.xlu0 %245 }
 0x1d6   : > { %v1443_v43 = vpop.xlane.xlu1 %251 }
 0x1d8   : > { %v1445_v44 = vpop.xlane.xlu0 %257 }
 0x1da   : > { %v1447_v45 = vpop.xlane.xlu1 %260 }
 0x1dc   : > { %v595_v46 = vpop.xlane.xlu0 %594 }
 0x1dd   : > { %vm617_vm4 = vcmp.ge.f32.partialorder %v1330_v4, %v595_v46  ;;  %v273_v4 = vsub.f32 %v1323_v61, %v1447_v45 }
 0x1de   : > { %v1449_v48 = vpop.xlane.xlu1 %597  ;;  %v625_v36 = vsel %vm617_vm4, %v1228_v1, 8  ;;  %vm481_vm4 = vcmask 1042434  }
 0x1df   : > { %v1507_v40 = vsel %vm46_vm0, %v625_v36, 2147483647  ;;  %vm618_vm11 = vcmp.ge.f32.partialorder %v1336_v8, %v1449_v48  ;;  %v268_v8 = vsub.f32 %v1307_v53, %v1441_v42 }
 0x1e0   : > { %v1451_v49 = vpop.xlane.xlu0 %248 }
 0x1e1   : > { %v269_v38 = vsub.f32 %v1342_v13, %v1451_v49 }
 0x1e2   : > { %v1453_v50 = vpop.xlane.xlu1 %254 }
 0x1e4   : > { %v1455_v52 = vpop.xlane.xlu0 %263 }
 0x1e6   : > { %v1457_v54 = vpop.xlane.xlu1 %266 }
 0x1e8   : > { %v1459_v57 = vpop.xlane.xlu0 %600 }
 0x1e9   : > { %vm619_vm12 = vcmp.ge.f32.partialorder %v1370_v39, %v1459_v57 }
 0x1ea   : > { %v1461_v58 = vpop.xlane.xlu1 %603 }
 0x1eb   : > { %vm620_vm14 = vcmp.ge.f32.partialorder %v1376_v35, %v1461_v58 }
 0x1ec   : > { %v1463_v62 = vpop.xlane.xlu0 %606 }
 0x1ed   : > { %vm621_vm10 = vcmp.ge.f32.partialorder %v1382_v47, %v1463_v62  ;;  %v627_v47 = vsel %vm619_vm12, %v1228_v1, 8 }
 0x1ee   : > { %v1465_v63 = vpop.xlane.xlu1 %609 }
 0x1ef   : > { %vm622_vm5 = vcmp.ge.f32.partialorder %v1391_v51, %v1465_v63  ;;  %v278_v51 = vmul.f32 1.442695, %v269_v38 }
 0x1f0   : > { %v1467_v0 = vpop.xlane.xlu0 %612  ;;  %v630_v41 = vsel %vm622_vm5, %v1228_v1, 8  ;;  %vm483_vm5 = vcmask 1043459  }
 0x1f1   : > { %1081 = vpow2.f32 %v278_v51  ;;  %vm623_vm13 = vcmp.ge.f32.partialorder %v1397_v56, %v1467_v0  ;;  %v272_v56 = vsub.f32 %v1311_v55, %v1445_v44 }
 0x1f2   : > { %v1469_v3 = vpop.xlane.xlu1 %615  ;;  %v631_v39 = vsel %vm623_vm13, %v1228_v1, 8 }
 0x1f3   : > { %vm624_vm8 = vcmp.ge.f32.partialorder %v1403_v59, %v1469_v3  ;;  %v284_v35 = vmul.f32 1.442695, %v272_v56 }
 0x1f4   : > { %v105_v5 = vpop.xlane.xlu0 %104 }
 0x1f5   : > { %v108_v7 = vcvt.f32.s32 %v105_v5  ;;  %v1517_v5 = vsel %vm46_vm0, %v630_v41, 2147483647 }
 0x1f6   : > { %v107_v6 = vpop.xlane.xlu1 %106  ;;  %v710_v61 = vshra.s32 %v1517_v5, 16 }
 0x1f7   : > { %v109_v9 = vcvt.f32.s32 %v107_v6  ;;  %v632_v6 = vsel %vm624_vm8, %v1228_v1, 8 }
 0x1f8   : > { %v1471_v10 = vpop.xlane.xlu0 %120  ;;  %v1526_v59 = vsel %vm46_vm0, %v632_v6, 2147483647 }
 0x1f9   : > { %v110_v14 = vshll.u32 %v109_v9, 16  ;;  %vm122_vm3 = vcmp.gt.f32.partialorder %v1471_v10, 0.5  ;;  %v274_v9 = vsub.f32 %v1354_v26, %v1455_v52 }
 0x1fa   : > { %v1474_v15 = vpop.permute.xlu1 %346 }
 0x1fb   : > { %v1476_v16 = vadd.s32 %v110_v14, %v108_v7   ;;  %v795_v17 = vadd.f32 %v595_v46, %v1474_v15  ;;  %v635_v46 = vshra.s32 %v1507_v40, 16  ;;  %v286_v7 = vmul.f32 1.442695, %v273_v4 }
 0x1fc   : > { %v1479_v20 = vpop.permute.xlu0 %353 }
 0x1fd   : > { %v1485_v29 = vsel %vm122_vm3, %v1476_v16, %v1151_v29   ;;  %v796_v22 = vadd.f32 %v1449_v48, %v1479_v20  ;;  %812 = vperm.xlu1 %1079, %v795_v17   ;;  %v1522_v14 = vcvt.s32.f32 %v635_v46  ;;  %1083 = vpow2.f32 %v286_v7 }
 0x1fe   : > { %v1820_v21 = vmov %v1485_v29  ;;  %v1489_v27 = vpop.permute.xlu1 %360  ;;  %v129_v29 = vadd.s32 %v128_v34, %v1476_v16  ;;  %v271_v17 = vsub.f32 %v1348_v19, %v1453_v50  ;;  %v740_v34 = vshra.s32 %v1526_v59, 16  ;;  %v1082_v19 = vpop.eup %1081 }
 0x1ff   : > { %815 = vperm.xlu0 %1080, %v796_v22   ;;  %v288_v22 = vmul.f32 1.442695, %v274_v9  ;;  %vm123_vm9 = vcmp.eq.s32.totalorder %v1228_v1, %v1476_v16  ;;  %v295_v51 = vsel %vm46_vm0, %v1082_v19, 0.0  ;;  %v797_v9 = vadd.f32 %v1459_v57, %v1489_v27 }
 0x200   : > { %vm130_vm6 = vcmp.eq.s32.totalorder %v1228_v1, %v129_v29  ;;  %v282_v26 = vmul.f32 1.442695, %v271_v17  ;;  %v275_v29 = vsub.f32 %v1360_v33, %v1457_v54  ;;  %v1539_v36 = vcvt.s32.f32 %v740_v34 }
 0x201   : > { %v137_v18 = vsel %vm130_vm6, %v1258_v24, 0.0  ;;  %1085 = vpow2.f32 %v288_v22  ;;  %v124_v38 = vsel %vm123_vm9, %v1423_v11, 0.0  ;;  %v1553_v22 = vpop.permute.xlu0 %381  ;;  %v276_v57 = vmul.f32 1.442695, %v268_v8 }
 0x202   : > { %v1491_v31 = vpop.permute.xlu1 %367  ;;  %v139_v13 = vsel %vm138_vm7, %v137_v18, 0.0  ;;  %1087 = vpow2.f32 %v282_v26  ;;  %v290_v41 = vmul.f32 1.442695, %v275_v29  ;;  %v125_v18 = vsel %vm46_vm0, %v124_v38, 0.0 }
 0x203   : > { %v798_v17 = vadd.f32 %v1461_v58, %v1491_v31  ;;  %v800_v34 = vadd.f32 %v1465_v63, %v1553_v22  ;;  %v629_v26 = vsel %vm621_vm10, %v1228_v1, 8  ;;  %v626_v38 = vsel %vm618_vm11, %v1228_v1, 8 }
 0x204   : > { %1089 = vpow2.f32 %v290_v41  ;;  %v1563_v29 = vsel %vm46_vm0, %v629_v26, 2147483647  ;;  %v1570_v63 = vsel %vm46_vm0, %v626_v38, 2147483647  ;;  %v1581_v41 = vsel %vm46_vm0, %v627_v47, 2147483647 }
 0x205   : > { %v695_v19 = vshra.s32 %v1563_v29, 16  ;;  %v665_v53 = vshra.s32 %v1581_v41, 16  ;;  %1091 = vpow2.f32 %v276_v57  ;;  %v1620_v26 = vsub.s32 %v1228_v1, %v1230_v2 }
 0x206   : > { %v1493_v37 = vpop.permute.xlu1 %374  ;;  %1093 = vpow2.f32 %v284_v35  ;;  %v634_v35 = vand.u32 65535, %v1507_v40  ;;  %vm485_vm6 = vcmask 1044484  }
 0x207   : > { %v799_v32 = vadd.f32 %v1463_v62, %v1493_v37  ;;  %v1084_v4 = vpop.eup %1083  ;;  %v1577_v48 = vcvt.s32.f32 %v695_v19  ;;  %v650_v62 = vshra.s32 %v1570_v63, 16  ;;  %v1599_v58 = vcvt.s32.f32 %v665_v53 }
 0x208   : > { %v307_v46 = vsel %vm46_vm0, %v1084_v4, 0.0  ;;  %v1593_v4 = vsel %vm46_vm0, %v631_v39, 2147483647 }
 0x209   : > { %824 = vperm.xlu1 %1079, %v799_v32   ;;  %v1531_v32 = vcvt.s32.f32 %v710_v61  ;;  %v725_v55 = vshra.s32 %v1593_v4, 16 }
 0x20b   : > { %v1086_v33 = vpop.eup %1085 }
 0x20c   : > { %v1088_v11 = vpop.eup %1087 }
 0x20d   : > { %v301_v6 = vsel %vm46_vm0, %v1088_v11, 0.0  ;;  %v1606_v11 = vcvt.s32.f32 %v725_v55  ;;  %v636_v55 = vcvt.s32.f32 %v634_v35 }
 0x20e   : > { %v1090_v7 = vpop.eup %1089 }
 0x20f   : > { %v313_v61 = vsel %vm46_vm0, %v1090_v7, 0.0  ;;  %v1092_v7 = vpop.eup %1091 }
 0x21e   : > { %140 = vadd.xlane.f32.xlu0 %v139_v13  ;;  %v310_v13 = vsel %vm46_vm0, %v1086_v33, 0.0 }
 0x222   : > { %638 = vmin.xlane.f32.xlu0 %v1522_v14 }
 0x226   : > { %713 = vmin.xlane.f32.xlu0 %v1531_v32 }
 0x22a   : > { %743 = vmin.xlane.f32.xlu0 %v1539_v36 }
 0x22d   : > { %126 = vadd.xlane.f32.xlu1 %v125_v18  ;;  %v1589_v18 = vcvt.s32.f32 %v650_v62 }
 0x22e   : > { %296 = vadd.xlane.f32.xlu0 %v295_v51  ;;  %v628_v51 = vsel %vm620_vm14, %v1228_v1, 8  ;;  %vm487_vm14 = vcmask 1045509  }
 0x22f   : > { %v1603_v33 = vsel %vm46_vm0, %v628_v51, 2147483647 }
 0x232   : > { %308 = vadd.xlane.f32.xlu0 %v307_v46  ;;  %v270_v46 = vsub.f32 %v1320_v60, %v1443_v43 }
 0x236   : > { %311 = vadd.xlane.f32.xlu0 %v310_v13  ;;  %v280_v13 = vmul.f32 1.442695, %v270_v46 }
 0x238   : > { %1095 = vpow2.f32 %v280_v13 }
 0x23a   : > { %302 = vadd.xlane.f32.xlu0 %v301_v6  ;;  %v680_v6 = vshra.s32 %v1603_v33, 16 }
 0x23c   : > { %v1610_v60 = vcvt.s32.f32 %v680_v6 }
 0x23e   : > { %818 = vperm.xlu1 %1079, %v797_v9   ;;  %314 = vadd.xlane.f32.xlu0 %v313_v61  ;;  %v1613_v9 = vpop.permute.xlu1 %388  ;;  %v292_v61 = vsel %vm46_vm0, %v1092_v7, 0.0 }
 0x23f   : > { %v801_v53 = vadd.f32 %v1467_v0, %v1613_v9 }
 0x242   : > { %821 = vperm.xlu1 %1079, %v798_v17   ;;  %v1094_v17 = vpop.eup %1093 }
 0x243   : > { %v304_v19 = vsel %vm46_vm0, %v1094_v17, 0.0  ;;  %v1096_v47 = vpop.eup %1095 }
 0x244   : > { %v298_v56 = vsel %vm46_vm0, %v1096_v47, 0.0 }
 0x254   : > { %827 = vperm.xlu0 %1080, %v800_v34   ;;  %v1616_v34 = vpop.permute.xlu0 %395 }
 0x266   : > { %698 = vmin.xlane.f32.xlu1 %v1577_v48 }
 0x26a   : > { %653 = vmin.xlane.f32.xlu1 %v1589_v18 }
 0x26e   : > { %668 = vmin.xlane.f32.xlu1 %v1599_v58 }
 0x272   : > { %728 = vmin.xlane.f32.xlu1 %v1606_v11 }
 0x276   : > { %683 = vmin.xlane.f32.xlu1 %v1610_v60 }
 0x27a   : > { %293 = vadd.xlane.f32.xlu1 %v292_v61 }
 0x27c   : > { %v813_v38 = vpop.permute.xlu1 %812 }
 0x27d   : > { %v838_v62 = vrot.slane %v813_v38, %v1620_v26 }
 0x27e   : > { %v816_v8 = vpop.permute.xlu0 %815  ;;  %305 = vadd.xlane.f32.xlu1 %v304_v19 }
 0x27f   : > { %v842_v39 = vrot.slane %v816_v8, %v1620_v26 }
 0x281   : > { %v867_v57 = vsel %vm479_vm15, %v842_v39, %v838_v62 }
 0x282   : > { %299 = vadd.xlane.f32.xlu1 %v298_v56 }
 0x288   : > { %v825_v13 = vpop.permute.xlu1 %824 }
 0x289   : > { %v854_v8 = vrot.slane %v825_v13, %v1620_v26 }
 0x293   : > { %830 = vperm.xlu1 %1079, %v801_v53  }
 0x2ab   : > { %v141_v51 = vpop.xlane.xlu0 %140 }
 0x2af   : > { %v1629_v46 = vpop.xlane.xlu0 %638 }
 0x2b0   : > { %vm640_vm2 = vcmp.eq.f32.partialorder %v1522_v14, %v1629_v46 }
 0x2b1   : > { %v641_v6 = vsel %vm640_vm2, %v636_v55, inf  ;;  %vm491_vm2 = vcmask 1047559  }
 0x2b3   : > { %v1646_v56 = vpop.xlane.xlu0 %713 }
 0x2b4   : > { %vm715_vm10 = vcmp.eq.f32.partialorder %v1531_v32, %v1646_v56 }
 0x2b7   : > { %642 = vmin.xlane.f32.xlu1 %v641_v6  ;;  %v1652_v35 = vpop.xlane.xlu0 %743 }
 0x2b8   : > { %vm745_vm13 = vcmp.eq.f32.partialorder %v1539_v36, %v1652_v35 }
 0x2ba   : > { %v127_v7 = vpop.xlane.xlu1 %126 }
 0x2bb   : > { %v142_v61 = vadd.f32 %v141_v51, %v127_v7  ;;  %v664_v7 = vand.u32 65535, %v1581_v41 }
 0x2bd   : > { %v143_v17 = vmul.f32 %v142_v61, %v1471_v10  ;;  %v297_v61 = vpop.xlane.xlu0 %296 }
 0x2be   : > { %v819_v38 = vpop.permute.xlu1 %818 }
 0x2bf   : > { %v1636_v28 = vadd.f32 %v1159_v28, %v143_v17   ;;  %v846_v19 = vrot.slane %v819_v38, %v1620_v26  ;;  %v724_v38 = vand.u32 65535, %v1593_v4 }
 0x2c1   : > { %v1821_v0 = vmov %v1636_v28  ;;  %v868_v40 = vsel %vm481_vm4, %v846_v19, %v867_v57  ;;  %v694_v28 = vand.u32 65535, %v1563_v29  ;;  %v649_v57 = vand.u32 65535, %v1570_v63 }
 0x2c2   : > { %v822_v47 = vpop.permute.xlu1 %821  ;;  %v666_v63 = vcvt.s32.f32 %v664_v7 }
 0x2c3   : > { %v850_v14 = vrot.slane %v822_v47, %v1620_v26  ;;  %v696_v51 = vcvt.s32.f32 %v694_v28  ;;  %v651_v6 = vcvt.s32.f32 %v649_v57  ;;  %v679_v47 = vand.u32 65535, %v1603_v33 }
 0x2c5   : > { %v869_v62 = vsel %vm483_vm5, %v850_v14, %v868_v40  ;;  %v309_v14 = vpop.xlane.xlu0 %308 }
 0x2c6   : > { %v1644_v39 = vsel %vm485_vm6, %v854_v8, %v869_v62  ;;  %v681_v8 = vcvt.s32.f32 %v679_v47  ;;  %v739_v62 = vand.u32 65535, %v1526_v59 }
 0x2c9   : > { %v312_v28 = vpop.xlane.xlu0 %311 }
 0x2f3   : > { %v1649_v53 = vpop.xlane.xlu1 %698 }
 0x2f4   : > { %vm700_vm7 = vcmp.eq.f32.partialorder %v1577_v48, %v1649_v53  ;;  %v709_v48 = vand.u32 65535, %v1517_v5 }
 0x2f5   : > { %v701_v55 = vsel %vm700_vm7, %v696_v51, inf  ;;  %vm489_vm7 = vcmask 1046534  }
 0x2f6   : > { %702 = vmin.xlane.f32.xlu1 %v701_v55  ;;  %v711_v40 = vcvt.s32.f32 %v709_v48  ;;  %v303_v55 = vpop.xlane.xlu0 %302 }
 0x2f7   : > { %v1656_v13 = vpop.xlane.xlu1 %653 }
 0x2f8   : > { %vm655_vm8 = vcmp.eq.f32.partialorder %v1589_v18, %v1656_v13  ;;  %v726_v18 = vcvt.s32.f32 %v724_v38  ;;  %v716_v5 = vsel %vm715_vm10, %v711_v40, inf }
 0x2f9   : > { %v656_v29 = vsel %vm655_vm8, %v651_v6, inf }
 0x2fa   : > { %657 = vmin.xlane.f32.xlu0 %v656_v29  ;;  %v315_v6 = vpop.xlane.xlu0 %314 }
 0x2fb   : > { %v1661_v17 = vpop.xlane.xlu1 %668 }
 0x2fc   : > { %vm670_vm9 = vcmp.eq.f32.partialorder %v1599_v58, %v1661_v17 }
 0x2fd   : > { %v671_v19 = vsel %vm670_vm9, %v666_v63, inf }
 0x2fe   : > { %672 = vmin.xlane.f32.xlu0 %v671_v19 }
 0x2ff   : > { %v1669_v41 = vpop.xlane.xlu1 %728 }
 0x300   : > { %vm730_vm11 = vcmp.eq.f32.partialorder %v1606_v11, %v1669_v41  ;;  %v741_v11 = vcvt.s32.f32 %v739_v62 }
 0x301   : > { %v731_v4 = vsel %vm730_vm11, %v726_v18, inf }
 0x302   : > { %732 = vmin.xlane.f32.xlu1 %v731_v4  ;;  %717 = vmin.xlane.f32.xlu0 %v716_v5  ;;  %v746_v51 = vsel %vm745_vm13, %v741_v11, inf }
 0x303   : > { %v1674_v58 = vpop.xlane.xlu1 %683 }
 0x304   : > { %vm685_vm12 = vcmp.eq.f32.partialorder %v1610_v60, %v1674_v58 }
 0x305   : > { %v686_v32 = vsel %vm685_vm12, %v681_v8, inf }
 0x306   : > { %687 = vmin.xlane.f32.xlu0 %v686_v32 }
 0x307   : > { %v294_v33 = vpop.xlane.xlu1 %293 }
 0x308   : > { %1097 = vlog2.f32 %v294_v33 }
 0x30a   : > { %747 = vmin.xlane.f32.xlu0 %v746_v51 }
 0x30b   : > { %v306_v57 = vpop.xlane.xlu1 %305 }
 0x30c   : > { %1099 = vlog2.f32 %v306_v57 }
 0x30d   : > { %1101 = vlog2.f32 %v297_v61 }
 0x30e   : > { %1103 = vlog2.f32 %v309_v14 }
 0x30f   : > { %v300_v59 = vpop.xlane.xlu1 %299 }
 0x310   : > { %1105 = vlog2.f32 %v300_v59  ;;  %v1702_v59 = vpop.permute.xlu0 %827 }
 0x311   : > { %1107 = vlog2.f32 %v312_v28 }
 0x312   : > { %v1098_v60 = vpop.eup %1097  ;;  %1109 = vlog2.f32 %v303_v55 }
 0x313   : > { %v317_v7 = vmul.f32 0.6931472, %v1098_v60  ;;  %1111 = vlog2.f32 %v315_v6 }
 0x315   : > { %v332_v36 = vadd.f32 %v317_v7, %v1441_v42  ;;  %v675_v7 = vcvt.f32.s32 %v1661_v17  ;;  %v690_v17 = vcvt.f32.s32 %v1674_v58 }
 0x316   : > { %v1100_v29 = vpop.eup %1099 }
 0x317   : > { %v1102_v63 = vpop.eup %1101  ;;  %v325_v38 = vmul.f32 0.6931472, %v1100_v29  ;;  %v405_v48 = vadd.f32 %v1474_v15, %v332_v36 }
 0x318   : > { %v1104_v19 = vpop.eup %1103  ;;  %v319_v61 = vmul.f32 0.6931472, %v1102_v63  ;;  %v676_v63 = vshll.u32 %v675_v7, 16 }
 0x319   : > { %424 = vperm.xlu1 %1079, %v405_v48   ;;  %v336_v40 = vadd.f32 %v325_v38, %v1445_v44  ;;  %v327_v14 = vmul.f32 0.6931472, %v1104_v19 }
 0x31a   : > { %v1106_v18 = vpop.eup %1105  ;;  %v333_v62 = vadd.f32 %v319_v61, %v1451_v49  ;;  %v705_v61 = vcvt.f32.s32 %v1649_v53  ;;  %v750_v53 = vcvt.f32.s32 %v1652_v35 }
 0x31b   : > { %v1108_v47 = vpop.eup %1107  ;;  %v321_v4 = vmul.f32 0.6931472, %v1106_v18  ;;  %v409_v32 = vadd.f32 %v1493_v37, %v336_v40  ;;  %v337_v15 = vadd.f32 %v327_v14, %v1447_v45 }
 0x31c   : > { %v1110_v5 = vpop.eup %1109  ;;  %v329_v42 = vmul.f32 0.6931472, %v1108_v47  ;;  %v406_v57 = vadd.f32 %v1479_v20, %v333_v62  ;;  %v720_v47 = vcvt.f32.s32 %v1646_v56 }
 0x31d   : > { %v334_v8 = vadd.f32 %v321_v4, %v1443_v43  ;;  %v1112_v28 = vpop.eup %1111  ;;  %v323_v33 = vmul.f32 0.6931472, %v1110_v5  ;;  %v410_v49 = vadd.f32 %v1553_v22, %v337_v15  ;;  %v645_v22 = vcvt.f32.s32 %v1629_v46 }
 0x31e   : > { %v338_v44 = vadd.f32 %v329_v42, %v1455_v52  ;;  %v331_v51 = vmul.f32 0.6931472, %v1112_v28  ;;  %v802_v52 = vadd.f32 %v1469_v3, %v1616_v34  ;;  %v735_v5 = vcvt.f32.s32 %v1669_v41 }
 0x31f   : > { %v407_v11 = vadd.f32 %v1489_v27, %v334_v8  ;;  %v335_v43 = vadd.f32 %v323_v33, %v1453_v50  ;;  %v1699_v50 = vpop.permute.xlu1 %830  ;;  %v721_v33 = vshll.u32 %v720_v47, 16 }
 0x320   : > { %436 = vperm.xlu0 %1080, %v409_v32   ;;  %v339_v37 = vadd.f32 %v331_v51, %v1457_v54  ;;  %v411_v45 = vadd.f32 %v1613_v9, %v338_v44  ;;  %v660_v54 = vcvt.f32.s32 %v1656_v13  ;;  %v706_v32 = vshll.u32 %v705_v61, 16 }
 0x321   : > { %430 = vperm.xlu1 %1079, %v407_v11   ;;  %v408_v55 = vadd.f32 %v1491_v31, %v335_v43  ;;  %v646_v31 = vshll.u32 %v645_v22, 16  ;;  %v691_v11 = vshll.u32 %v690_v17, 16  ;;  %v736_v56 = vshll.u32 %v735_v5, 16 }
 0x322   : > { %v412_v27 = vadd.f32 %v1616_v34, %v339_v37  ;;  %v661_v6 = vshll.u32 %v660_v54, 16  ;;  %v751_v37 = vshll.u32 %v750_v53, 16 }
 0x324   : > { %427 = vperm.xlu0 %1080, %v406_v57  }
 0x325   : > { %439 = vperm.xlu1 %1079, %v410_v49  }
 0x328   : > { %442 = vperm.xlu0 %1080, %v411_v45  }
 0x329   : > { %433 = vperm.xlu1 %1079, %v408_v55  }
 0x32c   : > { %445 = vperm.xlu0 %1080, %v412_v27  }
 0x32d   : > { %833 = vperm.xlu1 %1079, %v802_v52  }
 0x344   : > { %v643_v20 = vpop.xlane.xlu1 %642 }
 0x345   : > { %v644_v9 = vcvt.f32.s32 %v643_v20 }
 0x347   : > { %v647_v36 = vadd.s32 %v646_v31, %v644_v9 }
 0x349   : > { %v756_v38 = vrot.slane %v647_v36, %v1620_v26 }
 0x383   : > { %v703_v48 = vpop.xlane.xlu1 %702 }
 0x384   : > { %v704_v8 = vcvt.f32.s32 %v703_v48 }
 0x386   : > { %v707_v51 = vadd.s32 %v706_v32, %v704_v8 }
 0x387   : > { %v658_v60 = vpop.xlane.xlu0 %657 }
 0x388   : > { %v659_v29 = vcvt.f32.s32 %v658_v60  ;;  %v772_v55 = vrot.slane %v707_v51, %v1620_v26 }
 0x38a   : > { %v662_v3 = vadd.s32 %v661_v6, %v659_v29 }
 0x38b   : > { %v673_v34 = vpop.xlane.xlu0 %672 }
 0x38c   : > { %v760_v46 = vrot.slane %v662_v3, %v1620_v26  ;;  %v674_v19 = vcvt.f32.s32 %v673_v34 }
 0x38e   : > { %v785_v18 = vsel %vm479_vm15, %v760_v46, %v756_v38  ;;  %v677_v13 = vadd.s32 %v676_v63, %v674_v19 }
 0x38f   : > { %v718_v40 = vpop.xlane.xlu0 %717  ;;  %v733_v4 = vpop.xlane.xlu1 %732 }
 0x390   : > { %v764_v14 = vrot.slane %v677_v13, %v1620_v26  ;;  %v719_v42 = vcvt.f32.s32 %v718_v40  ;;  %v734_v28 = vcvt.f32.s32 %v733_v4  ;;  %v858_v13 = vrot.slane %v1702_v59, %v1620_v26 }
 0x391   : > { %v862_v40 = vrot.slane %v1699_v50, %v1620_v26 }
 0x392   : > { %v786_v62 = vsel %vm481_vm4, %v764_v14, %v785_v18  ;;  %v722_v58 = vadd.s32 %v721_v33, %v719_v42  ;;  %v737_v43 = vadd.s32 %v736_v56, %v734_v28  ;;  %v871_v32 = vsel %vm487_vm14, %v858_v13, %v1644_v39 }
 0x393   : > { %v688_v15 = vpop.xlane.xlu0 %687 }
 0x394   : > { %v689_v44 = vcvt.f32.s32 %v688_v15  ;;  %v776_v27 = vrot.slane %v722_v58, %v1620_v26  ;;  %v780_v20 = vrot.slane %v737_v43, %v1620_v26  ;;  %v872_v15 = vsel %vm489_vm7, %v862_v40, %v871_v32 }
 0x396   : > { %v692_v57 = vadd.s32 %v691_v11, %v689_v44 }
 0x397   : > { %v748_v49 = vpop.xlane.xlu0 %747 }
 0x398   : > { %v768_v41 = vrot.slane %v692_v57, %v1620_v26  ;;  %v749_v45 = vcvt.f32.s32 %v748_v49  ;;  %v425_v31 = vpop.permute.xlu1 %424 }
 0x399   : > { %v450_v38 = vrot.slane %v425_v31, %v1620_v26 }
 0x39a   : > { %v787_v52 = vsel %vm483_vm5, %v768_v41, %v786_v62  ;;  %v752_v35 = vadd.s32 %v751_v37, %v749_v45 }
 0x39b   : > { %v788_v22 = vsel %vm485_vm6, %v772_v55, %v787_v52 }
 0x39c   : > { %v789_v54 = vsel %vm487_vm14, %v776_v27, %v788_v22  ;;  %v784_v9 = vrot.slane %v752_v35, %v1620_v26 }
 0x39d   : > { %v790_v60 = vsel %vm489_vm7, %v780_v20, %v789_v54 }
 0x39e   : > { %v791_v6 = vsel %vm491_vm2, %v784_v9, %v790_v60 }
 0x39f   : > { %v437_v7 = vpop.permute.xlu0 %436  ;;  %v792_v36 = vsel %vm122_vm3, %v791_v6, %v1228_v1 }
 0x3a0   : > { %v431_v29 = vpop.permute.xlu1 %430  ;;  %794 = vst.msk [vmem:[%s793_s24] sm:$0xff] %vm46_vm0, %v792_v36  ;;  %v466_v47 = vrot.slane %v437_v7, %v1620_v26 }
 0x3a1   : > { %v458_v19 = vrot.slane %v431_v29, %v1620_v26  ;;  %v1822_v29 = vmov %v1820_v21 }
 0x3a3   : > { %v428_v3 = vpop.permute.xlu0 %427 }
 0x3a4   : > { %v454_v34 = vrot.slane %v428_v3, %v1620_v26  ;;  %v440_v63 = vpop.permute.xlu1 %439 }
 0x3a5   : > { %v470_v14 = vrot.slane %v440_v63, %v1620_v26 }
 0x3a6   : > { %v480_v48 = vsel %vm479_vm15, %v454_v34, %v450_v38 }
 0x3a7   : > { %v443_v46 = vpop.permute.xlu0 %442  ;;  %v482_v17 = vsel %vm481_vm4, %v458_v19, %v480_v48  ;;  %vm902_vm4 = vcmask (%p80_p0), 7168  }
 0x3a8   : > { %v434_v18 = vpop.permute.xlu1 %433  ;;  %v474_v8 = vrot.slane %v443_v46, %v1620_v26 }
 0x3a9   : > { %v462_v61 = vrot.slane %v434_v18, %v1620_v26  ;;  %v1823_v18 = vmov %v1476_v16 }
 0x3ab   : > { %v484_v4 = vsel %vm483_vm5, %v462_v61, %v482_v17  ;;  %v446_v5 = vpop.permute.xlu0 %445  ;;  %82 = sbr.rel (!%p80_p0) target bundleno = 311 (0x137), region = 77 }
 0x3ac   : > { %v486_v62 = vsel %vm485_vm6, %v466_v47, %v484_v4  ;;  %v478_v59 = vrot.slane %v446_v5, %v1620_v26  ;;  %v834_v42 = vpop.permute.xlu1 %833 }
 0x3ad   : > { %v488_v50 = vsel %vm487_vm14, %v470_v14, %v486_v62  ;;  %v866_v28 = vrot.slane %v834_v42, %v1620_v26 }
 0x3ae   : > { %v490_v33 = vsel %vm489_vm7, %v474_v8, %v488_v50 }
 0x3af   : > { %v492_v53 = vsel %vm491_vm2, %v478_v59, %v490_v33  ;;  %v873_v11 = vsel %vm491_vm2, %v866_v28, %v872_v15  ;;  %v1824_v28 = vmov %v1821_v0 }
 0x3b0   : > { %v494_v44 = vsel %vm122_vm3, %v492_v53, %v1167_v12   ;;  %v875_v39 = vsel %vm122_vm3, %v873_v11, %v1163_v30   ;;  %vm876_vm3 = vcmp.eq.s32.totalorder (%p80_p0), %v1228_v1, %v1820_v21 }
 0x3b1   : > { %v1825_v30 = vmov %v875_v39  ;;  %v1826_v12 = vmov %v494_v44  ;;  %v888_v10 = vadd.f32 (%p80_p0), %v1263_v25, %v494_v44  ;;  %v883_v16 = vsel (%p80_p0), %vm876_vm3, %v1263_v25, 0.0 }
 0x3b2   :  { %v904_v12 = vadd.f32 %v1263_v25, %v875_v39  ;;  %v884_v51 = vsel %vm46_vm0, %v883_v16, 0.0 }
 0x3b3   :  { %v889_v56 = vsel %vm46_vm0, %v888_v10, -inf }
 0x3b4   :  { %v905_v26 = vsel %vm46_vm0, %v904_v12, -inf }
 0x3b5   :  { %906 = vmax.xlane.f32.xlu0 %v905_v26 }
 0x3b9   :  { %890 = vmax.xlane.f32.xlu0 %v889_v56 }
 0x3bd   :  { %885 = vadd.xlane.f32.xlu0 %v884_v51 }
 0x442   :  { %v907_v58 = vpop.xlane.xlu0 %906 }
 0x443   :  { %vm908_vm15 = vcmp.ge.f32.partialorder %v904_v12, %v907_v58 }
 0x444   :  { %v909_v2 = vsel %vm908_vm15, %v1228_v1, 8 }
 0x445   :  { %v910_v23 = vsel %vm46_vm0, %v909_v2, 2147483647 }
 0x446   :  { %v891_v24 = vpop.xlane.xlu0 %890  ;;  %v912_v30 = vshra.s32 %v910_v23, 16  ;;  %v911_v25 = vand.u32 65535, %v910_v23 }
 0x447   :  { %v892_v57 = vsub.f32 %v888_v10, %v891_v24 }
 0x448   :  { %v914_v43 = vcvt.s32.f32 %v912_v30  ;;  %v913_v45 = vcvt.s32.f32 %v911_v25 }
 0x449   :  { %v893_v49 = vmul.f32 1.442695, %v892_v57 }
 0x44a   :  { %915 = vmin.xlane.f32.xlu1 %v914_v43  ;;  %v886_v52 = vpop.xlane.xlu0 %885 }
 0x44b   :  { %1113 = vpow2.f32 %v893_v49  ;;  %v887_v22 = vadd.f32 %v886_v52, %v1821_v0 }
 0x455   :  { %v1114_v37 = vpop.eup %1113 }
 0x456   :  { %v895_v21 = vsel %vm46_vm0, %v1114_v37, 0.0 }
 0x457   :  { %896 = vadd.xlane.f32.xlu1 %v895_v21 }
 0x4d7   :  { %v916_v41 = vpop.xlane.xlu1 %915 }
 0x4d8   :  { %vm917_vm1 = vcmp.eq.f32.partialorder %v914_v43, %v916_v41  ;;  %v922_v31 = vcvt.f32.s32 %v916_v41 }
 0x4d9   :  { %v918_v55 = vsel %vm917_vm1, %v913_v45, inf }
 0x4da   :  { %919 = vmin.xlane.f32.xlu1 %v918_v55  ;;  %v923_v6 = vshll.u32 %v922_v31, 16 }
 0x4e4   :  { %v897_v27 = vpop.xlane.xlu1 %896 }
 0x4e5   :  { %1115 = vlog2.f32 %v897_v27 }
 0x4ef   :  { %v1116_v35 = vpop.eup %1115 }
 0x4f0   :  { %v899_v20 = vmul.f32 0.6931472, %v1116_v35 }
 0x4f2   :  { %v900_v54 = vadd.f32 %v899_v20, %v891_v24 }
 0x4f4   :  { %v901_v9 = vsub.f32 %v887_v22, %v900_v54 }
 0x4f6   :  { %903 = vst.msk [vmem:[%s1816_s7] sm:$0xff] %vm902_vm4, %v901_v9 }
 0x567   :  { %v920_v60 = vpop.xlane.xlu1 %919 }
 0x568   :  { %v921_v7 = vcvt.f32.s32 %v920_v60 }
 0x56a   :  { %v924_v36 = vadd.s32 %v923_v6, %v921_v7  }
 0x56c   :  { %1010 = vst.msk [vmem:[%s1817_s8 + $0x38] sm:$0xff] %vm902_vm4, %v924_v36  ;;  %v1173_v29 = vmov %v924_v36  }
 0x56d LB: > { %s935_s27 = ssub.s32 7, %s1179_s26  ;;  %vm939_vm5 = vcmp.eq.s32.totalorder %v1228_v1, %v1175_v29  ;;  %s934_s29 = ssub.s32 6, %s1179_s26  ;;  %s1179_s26 = sphi %s1798_s26, %s932_s26   ;;  %v1175_v29 = vphi %v1173_v29, %v953_v29  }
 0x56e   : > { %s1011_s7 = sshll.u32 %s935_s27, 3  ;;  %s1012_s30 = sshll.u32 %s934_s29, 3 }
 0x56f   : > { %s937_s28 = scalar_lea.vmem [#allocation2], %s1011_s7  ;;  %s955_s5 = scalar_lea.vmem %s1817_s8, %s1012_s30 }
 0x570   : > { %v938_v0 = vld [vmem:[%s937_s28] sm:$0xff]  ;;  %s932_s26 = sadd.s32 1, %s1179_s26  }
 0x571   : > { %v940_v3 = vsel %vm939_vm5, %v938_v0, 0  ;;  %p929_p1 = scmp.ge.s32.totalorder %s932_s26, 7  }
 0x572   : > { %v941_v34 = vsel %vm46_vm0, %v940_v3, 0 }
 0x573   : > { %v943_v63 = vshrl.u32 %v941_v34, 16  ;;  %v942_v38 = vand.u32 65535, %v941_v34 }
 0x575   : > { %v945_v48 = vcvt.s32.f32 %v943_v63  ;;  %v944_v46 = vcvt.s32.f32 %v942_v38 }
 0x577   : > { %948 = vadd.xlane.f32.xlu0 %v945_v48 }
 0x57b   : > { %946 = vadd.xlane.f32.xlu0 %v944_v46 }
 0x604   : > { %v949_v19 = vpop.xlane.xlu0 %948 }
 0x605   : > { %v951_v18 = vcvt.f32.s32 %v949_v19 }
 0x607   : > { %v952_v61 = vshll.u32 %v951_v18, 16  ;;  %931 = sbr.rel (!%p929_p1) target bundleno = 1389 (0x56d), region = 88 }
 0x608   : > { %v947_v13 = vpop.xlane.xlu0 %946 }
 0x609   : > { %v950_v40 = vcvt.f32.s32 %v947_v13 }
 0x60b   : > { %v953_v29 = vadd.s32 %v952_v61, %v950_v40  }
 0x60d   : > { %956 = vst.msk [vmem:[%s955_s5] sm:$0xff] %vm902_vm4, %v953_v29 }

</bundles_post_ra>
